<compile_context>
chip_gen: v7x
topology: tpu7x:2x2x1
jax: 0.10.0
libtpu: 0.0.40
codegen_flags: <defaults>
</compile_context>

<pallas_src>
import jax
import jax.numpy as jnp
from jax.experimental import pallas as pl
from jax.experimental.pallas import tpu as pltpu


# ------------------------------------------------------------------ layout

def _round_up(x, m):
    return (x + m - 1) // m * m


def _make_layout(input_dim, hidden_dim, output_dim, n_layers):
    """Row/col offsets of every parameter inside the single packed weight slab."""
    H, G = hidden_dim, 3 * hidden_dim
    width = _round_up(max(G + H, output_dim), 128)
    rows = 0
    layers = []
    for l in range(n_layers):
        din = input_dim if l == 0 else H
        row_wi = rows; rows += _round_up(din, 8)
        row_wh = rows; rows += _round_up(H, 8)
        row_b = rows;  rows += 8            # one bias row, padded to a sublane group
        layers.append((row_wi, row_wh, row_b, din))
    row_wlin = rows; rows += _round_up(H, 8)
    row_blin = rows; rows += 8
    return dict(layers=layers, head=(row_wlin, row_blin),
                rows=rows, width=width)


def _pack_weights(params, layout, H, O):
    """Pack all layer + head parameters into one (rows, width) f32 slab."""
    G = 3 * H
    slab = jnp.zeros((layout["rows"], layout["width"]), jnp.float32)
    for l, p in enumerate(params["gru_layers"]):
        row_wi, row_wh, row_b, din = layout["layers"][l]
        wi = jnp.concatenate([p["wir"], p["wiz"], p["win"]], axis=1)   # (din, 3H)
        wh = jnp.concatenate([p["whr"], p["whz"], p["whn"]], axis=1)   # (H, 3H)
        bi = jnp.concatenate([p["bir"] + p["bhr"],
                              p["biz"] + p["bhz"],
                              p["bin_"]], axis=1)                      # (1, 3H)
        slab = slab.at[row_wi:row_wi + din, :G].set(wi)
        slab = slab.at[row_wh:row_wh + H, :G].set(wh)
        slab = slab.at[row_b, :G].set(bi[0])
        slab = slab.at[row_b, G:G + H].set(p["bhn"][0])
    row_wlin, row_blin = layout["head"]
    slab = slab.at[row_wlin:row_wlin + H, :O].set(params["w_lin"])
    slab = slab.at[row_blin, :O].set(params["b_lin"][0])
    return slab


# ------------------------------------------------------------------ kernel

def _make_fused_gru_kernel(B, T, H, O, n_layers, layout):
    G = 3 * H

    def gru_step(gx_t, h, wh, bhn):
        # gx_t already holds x @ W_i + [bir+bhr, biz+bhz, bin]
        gh = jnp.dot(h, wh, preferred_element_type=jnp.float32)        # (B, 3H)
        rz = jax.nn.sigmoid(gx_t[:, :2 * H] + gh[:, :2 * H])           # fused r|z
        r, z = rz[:, :H], rz[:, H:]
        n = jnp.tanh(gx_t[:, 2 * H:] + r * (gh[:, 2 * H:] + bhn))
        return (1.0 - z) * n + z * h

    def kernel(x_ref, w_ref, o_ref):
        # Static, sublane-aligned slices of the single packed weight slab.
        layer_w = []
        for l in range(n_layers):
            row_wi, row_wh, row_b, din = layout["layers"][l]
            wi = w_ref[row_wi:row_wi + din, 0:G]
            wh = w_ref[row_wh:row_wh + H, 0:G]
            bi = w_ref[row_b:row_b + 1, 0:G]
            bhn = jnp.broadcast_to(w_ref[row_b:row_b + 1, G:G + H], (B, H))
            layer_w.append((wi, wh, bi, bhn))
        row_wlin, row_blin = layout["head"]
        w_lin = w_ref[row_wlin:row_wlin + H, 0:O]
        b_lin = w_ref[row_blin:row_blin + 1, 0:O]

        wi0, wh0, bi0, bhn0 = layer_w[0]
        # Layer-0 input projection for ALL timesteps: one MXU dot, hoisted off
        # the recurrent critical path.  x_ref is time-major: row = t*B + b.
        gx0 = jnp.dot(x_ref[...], wi0, preferred_element_type=jnp.float32) + bi0

        h = [jnp.zeros((B, H), jnp.float32) for _ in range(n_layers)]

        # Wavefront: all layers advance within the same timestep iteration, so
        # layer-l step t and layer-0 step t+1 are independent in the fully
        # unrolled dataflow graph and pipeline back-to-back on the MXU.
        for t in range(T):                                  # T small & static
            h[0] = gru_step(gx0[t * B:(t + 1) * B, :], h[0], wh0, bhn0)
            for l in range(1, n_layers):
                wi, wh, bi, bhn = layer_w[l]
                gx = jnp.dot(h[l - 1], wi, preferred_element_type=jnp.float32) + bi
                h[l] = gru_step(gx, h[l], wh, bhn)

        # Fused head: out = ReLU(h_last) @ W + b
        hr = jnp.maximum(h[-1], 0.0)
        o_ref[...] = (jnp.dot(hr, w_lin, preferred_element_type=jnp.float32)
                      + b_lin).astype(o_ref.dtype)

    return kernel


# ------------------------------------------------------------------ wrapper

def _gru_forward_impl(x_btd, params):
    B, T, Din = x_btd.shape
    layers = params["gru_layers"]
    n_layers = len(layers)
    H = layers[0]["whr"].shape[0]
    O = params["w_lin"].shape[1]

    layout = _make_layout(Din, H, O, n_layers)
    w_slab = _pack_weights(params, layout, H, O)            # one ~86 KB input

    # Time-major (T*B, Din) slab, row = t*B + b (tiny; fused by XLA).
    x_tm = jnp.transpose(x_btd, (1, 0, 2)).reshape(T * B, Din)

    kernel = _make_fused_gru_kernel(B, T, H, O, n_layers, layout)

    return pl.pallas_call(
        kernel,
        out_shape=jax.ShapeDtypeStruct((B, O), jnp.float32),
        grid_spec=pltpu.PrefetchScalarGridSpec(
            num_scalar_prefetch=0,
            grid=(1,),                                       # single invocation
            in_specs=[
                pl.BlockSpec((T * B, Din), lambda i: (0, 0)),
                pl.BlockSpec((layout["rows"], layout["width"]), lambda i: (0, 0)),
            ],
            out_specs=pl.BlockSpec((B, O), lambda i: (0, 0)),
        ),
        compiler_params=pltpu.CompilerParams(
            dimension_semantics=("arbitrary",)),
    )(x_tm, w_slab)


gru_forward = jax.jit(_gru_forward_impl)


# ------------------------------------------------------------------ params

def init_params(key, input_dim, hidden_dim, output_dim, n_layers):
    k = 1.0 / float(hidden_dim) ** 0.5   # PyTorch GRU / Linear init range

    def u(kk, shape):
        return jax.random.uniform(kk, shape, jnp.float32, -k, k)

    layers = []
    for l in range(n_layers):
        din = input_dim if l == 0 else hidden_dim
        key, *ks = jax.random.split(key, 13)
        layers.append(dict(
            wir=u(ks[0], (din, hidden_dim)),
            wiz=u(ks[1], (din, hidden_dim)),
            win=u(ks[2], (din, hidden_dim)),
            whr=u(ks[3], (hidden_dim, hidden_dim)),
            whz=u(ks[4], (hidden_dim, hidden_dim)),
            whn=u(ks[5], (hidden_dim, hidden_dim)),
            bir=u(ks[6], (1, hidden_dim)),
            biz=u(ks[7], (1, hidden_dim)),
            bin_=u(ks[8], (1, hidden_dim)),
            bhr=u(ks[9], (1, hidden_dim)),
            bhz=u(ks[10], (1, hidden_dim)),
            bhn=u(ks[11], (1, hidden_dim)),
        ))
    key, k1, k2 = jax.random.split(key, 3)
    return dict(
        gru_layers=layers,
        w_lin=u(k1, (hidden_dim, output_dim)),
        b_lin=u(k2, (1, output_dim)),
    )


# ------------------------------------------------------------------ reference

def gru_forward_ref(x_btd, params):
    h_seq = jnp.transpose(x_btd, (1, 0, 2))
    for p in params["gru_layers"]:
        B = h_seq.shape[1]
        H = p["whr"].shape[1]

        def step(h, x_t, p=p):
            r = jax.nn.sigmoid(x_t @ p["wir"] + p["bir"] + h @ p["whr"] + p["bhr"])
            z = jax.nn.sigmoid(x_t @ p["wiz"] + p["biz"] + h @ p["whz"] + p["bhz"])
            n = jnp.tanh(x_t @ p["win"] + p["bin_"] + r * (h @ p["whn"] + p["bhn"]))
            h_new = (1.0 - z) * n + z * h
            return h_new, h_new

        h0 = jnp.zeros((B, H), jnp.float32)
        _, h_seq = jax.lax.scan(step, h0, h_seq)
    h_last = h_seq[-1]
    return jnp.maximum(h_last, 0.0) @ params["w_lin"] + params["b_lin"]


# ------------------------------------------------------------------ main

if __name__ == "__main__":
    B, T, D, H, O, L = 8, 8, 16, 32, 8, 2

    key = jax.random.PRNGKey(0)
    key, kx, kp = jax.random.split(key, 3)
    x = jax.random.normal(kx, (B, T, D), jnp.float32)
    params = init_params(kp, D, H, O, L)

    out = jax.block_until_ready(gru_forward(x, params))
    ref = jax.block_until_ready(gru_forward_ref(x, params))

    assert out.shape == (B, O), out.shape
    assert jnp.allclose(out, ref, rtol=1e-2, atol=1e-3), (
        float(jnp.max(jnp.abs(out - ref))))

    print("KERNEL_OK")
</pallas_src>

<mosaic_0001>
module attributes {stable_mosaic.version = 11 : i64} {
  func.func @kernel(%arg0: i32, %arg1: memref<64x16xf32, #tpu.memory_space<vmem>>, %arg2: memref<168x128xf32, #tpu.memory_space<vmem>>, %arg3: memref<8x8xf32, #tpu.memory_space<vmem>>) attributes {dimension_semantics = [#tpu.dimension_semantics<arbitrary>], iteration_bounds = array<i64: 1>, scalar_prefetch = 0 : i64, scratch_operands = 0 : i64, tpu.core_type = #tpu.core_type<tc>, window_params = [{pipeline_mode = #tpu.pipeline_mode<synchronous>, transform_indices = @transform_0, window_bounds = array<i64: 64, 16>}, {pipeline_mode = #tpu.pipeline_mode<synchronous>, transform_indices = @transform_1, window_bounds = array<i64: 168, 128>}, {pipeline_mode = #tpu.pipeline_mode<synchronous>, transform_indices = @transform_2, window_bounds = array<i64: 8, 8>}]} {
    %c0 = arith.constant 0 : index
    %c0_0 = arith.constant 0 : index
    %0 = vector.load %arg2[%c0, %c0_0] : memref<168x128xf32, #tpu.memory_space<vmem>>, vector<16x96xf32>
    %c16 = arith.constant 16 : index
    %c0_1 = arith.constant 0 : index
    %1 = vector.load %arg2[%c16, %c0_1] : memref<168x128xf32, #tpu.memory_space<vmem>>, vector<32x96xf32>
    %c48 = arith.constant 48 : index
    %c0_2 = arith.constant 0 : index
    %2 = vector.load %arg2[%c48, %c0_2] : memref<168x128xf32, #tpu.memory_space<vmem>>, vector<1x96xf32>
    %c48_3 = arith.constant 48 : index
    %c96 = arith.constant 96 : index
    %3 = vector.load %arg2[%c48_3, %c96] : memref<168x128xf32, #tpu.memory_space<vmem>>, vector<1x32xf32>
    %4 = vector.shape_cast %3 : vector<1x32xf32> to vector<1x32xf32>
    %5 = vector.broadcast %4 : vector<1x32xf32> to vector<8x32xf32>
    %c56 = arith.constant 56 : index
    %c0_4 = arith.constant 0 : index
    %6 = vector.load %arg2[%c56, %c0_4] : memref<168x128xf32, #tpu.memory_space<vmem>>, vector<32x96xf32>
    %c88 = arith.constant 88 : index
    %c0_5 = arith.constant 0 : index
    %7 = vector.load %arg2[%c88, %c0_5] : memref<168x128xf32, #tpu.memory_space<vmem>>, vector<32x96xf32>
    %c120 = arith.constant 120 : index
    %c0_6 = arith.constant 0 : index
    %8 = vector.load %arg2[%c120, %c0_6] : memref<168x128xf32, #tpu.memory_space<vmem>>, vector<1x96xf32>
    %c120_7 = arith.constant 120 : index
    %c96_8 = arith.constant 96 : index
    %9 = vector.load %arg2[%c120_7, %c96_8] : memref<168x128xf32, #tpu.memory_space<vmem>>, vector<1x32xf32>
    %10 = vector.shape_cast %9 : vector<1x32xf32> to vector<1x32xf32>
    %11 = vector.broadcast %10 : vector<1x32xf32> to vector<8x32xf32>
    %c128 = arith.constant 128 : index
    %c0_9 = arith.constant 0 : index
    %12 = vector.load %arg2[%c128, %c0_9] : memref<168x128xf32, #tpu.memory_space<vmem>>, vector<32x8xf32>
    %c160 = arith.constant 160 : index
    %c0_10 = arith.constant 0 : index
    %13 = vector.load %arg2[%c160, %c0_10] : memref<168x128xf32, #tpu.memory_space<vmem>>, vector<1x8xf32>
    %c0_11 = arith.constant 0 : index
    %c0_12 = arith.constant 0 : index
    %14 = vector.load %arg1[%c0_11, %c0_12] : memref<64x16xf32, #tpu.memory_space<vmem>>, vector<64x16xf32>
    %cst = arith.constant dense<0.000000e+00> : vector<64x96xf32>
    %15 = tpu.matmul %14, %0, %cst {dimension_numbers = #tpu.dot_dimension_numbers<[1], [0], [0], [1], [0, 0, 1, 1], [], []>} : vector<64x16xf32>, vector<16x96xf32>, vector<64x96xf32> -> vector<64x96xf32>
    %16 = vector.broadcast %2 : vector<1x96xf32> to vector<64x96xf32>
    %17 = arith.addf %15, %16 : vector<64x96xf32>
    %cst_13 = arith.constant 0.000000e+00 : f32
    %18 = vector.broadcast %cst_13 : f32 to vector<8x32xf32>
    %cst_14 = arith.constant 0.000000e+00 : f32
    %19 = vector.broadcast %cst_14 : f32 to vector<8x32xf32>
    %20 = vector.extract_strided_slice %17 {offsets = [0, 0], sizes = [8, 96], strides = [1, 1]} : vector<64x96xf32> to vector<8x96xf32>
    %cst_15 = arith.constant dense<0.000000e+00> : vector<8x96xf32>
    %21 = tpu.matmul %18, %1, %cst_15 {dimension_numbers = #tpu.dot_dimension_numbers<[1], [0], [0], [1], [0, 0, 1, 1], [], []>} : vector<8x32xf32>, vector<32x96xf32>, vector<8x96xf32> -> vector<8x96xf32>
    %22 = vector.extract_strided_slice %20 {offsets = [0, 0], sizes = [8, 64], strides = [1, 1]} : vector<8x96xf32> to vector<8x64xf32>
    %23 = vector.extract_strided_slice %21 {offsets = [0, 0], sizes = [8, 64], strides = [1, 1]} : vector<8x96xf32> to vector<8x64xf32>
    %24 = arith.addf %22, %23 : vector<8x64xf32>
    %25 = arith.negf %24 : vector<8x64xf32>
    %26 = math.exp %25 : vector<8x64xf32>
    %cst_16 = arith.constant 1.000000e+00 : f32
    %27 = vector.broadcast %cst_16 : f32 to vector<8x64xf32>
    %28 = arith.addf %27, %26 : vector<8x64xf32>
    %29 = arith.divf %27, %28 : vector<8x64xf32>
    %30 = vector.extract_strided_slice %29 {offsets = [0, 0], sizes = [8, 32], strides = [1, 1]} : vector<8x64xf32> to vector<8x32xf32>
    %31 = vector.extract_strided_slice %29 {offsets = [0, 32], sizes = [8, 32], strides = [1, 1]} : vector<8x64xf32> to vector<8x32xf32>
    %32 = vector.extract_strided_slice %20 {offsets = [0, 64], sizes = [8, 32], strides = [1, 1]} : vector<8x96xf32> to vector<8x32xf32>
    %33 = vector.extract_strided_slice %21 {offsets = [0, 64], sizes = [8, 32], strides = [1, 1]} : vector<8x96xf32> to vector<8x32xf32>
    %34 = arith.addf %33, %5 : vector<8x32xf32>
    %35 = arith.mulf %30, %34 : vector<8x32xf32>
    %36 = arith.addf %32, %35 : vector<8x32xf32>
    %37 = math.tanh %36 : vector<8x32xf32>
    %cst_17 = arith.constant 1.000000e+00 : f32
    %38 = vector.broadcast %cst_17 : f32 to vector<8x32xf32>
    %39 = arith.subf %38, %31 : vector<8x32xf32>
    %40 = arith.mulf %39, %37 : vector<8x32xf32>
    %41 = arith.mulf %31, %18 : vector<8x32xf32>
    %42 = arith.addf %40, %41 : vector<8x32xf32>
    %cst_18 = arith.constant dense<0.000000e+00> : vector<8x96xf32>
    %43 = tpu.matmul %42, %6, %cst_18 {dimension_numbers = #tpu.dot_dimension_numbers<[1], [0], [0], [1], [0, 0, 1, 1], [], []>} : vector<8x32xf32>, vector<32x96xf32>, vector<8x96xf32> -> vector<8x96xf32>
    %44 = vector.broadcast %8 : vector<1x96xf32> to vector<8x96xf32>
    %45 = arith.addf %43, %44 : vector<8x96xf32>
    %cst_19 = arith.constant dense<0.000000e+00> : vector<8x96xf32>
    %46 = tpu.matmul %19, %7, %cst_19 {dimension_numbers = #tpu.dot_dimension_numbers<[1], [0], [0], [1], [0, 0, 1, 1], [], []>} : vector<8x32xf32>, vector<32x96xf32>, vector<8x96xf32> -> vector<8x96xf32>
    %47 = vector.extract_strided_slice %45 {offsets = [0, 0], sizes = [8, 64], strides = [1, 1]} : vector<8x96xf32> to vector<8x64xf32>
    %48 = vector.extract_strided_slice %46 {offsets = [0, 0], sizes = [8, 64], strides = [1, 1]} : vector<8x96xf32> to vector<8x64xf32>
    %49 = arith.addf %47, %48 : vector<8x64xf32>
    %50 = arith.negf %49 : vector<8x64xf32>
    %51 = math.exp %50 : vector<8x64xf32>
    %cst_20 = arith.constant 1.000000e+00 : f32
    %52 = vector.broadcast %cst_20 : f32 to vector<8x64xf32>
    %53 = arith.addf %52, %51 : vector<8x64xf32>
    %54 = arith.divf %52, %53 : vector<8x64xf32>
    %55 = vector.extract_strided_slice %54 {offsets = [0, 0], sizes = [8, 32], strides = [1, 1]} : vector<8x64xf32> to vector<8x32xf32>
    %56 = vector.extract_strided_slice %54 {offsets = [0, 32], sizes = [8, 32], strides = [1, 1]} : vector<8x64xf32> to vector<8x32xf32>
    %57 = vector.extract_strided_slice %45 {offsets = [0, 64], sizes = [8, 32], strides = [1, 1]} : vector<8x96xf32> to vector<8x32xf32>
    %58 = vector.extract_strided_slice %46 {offsets = [0, 64], sizes = [8, 32], strides = [1, 1]} : vector<8x96xf32> to vector<8x32xf32>
    %59 = arith.addf %58, %11 : vector<8x32xf32>
    %60 = arith.mulf %55, %59 : vector<8x32xf32>
    %61 = arith.addf %57, %60 : vector<8x32xf32>
    %62 = math.tanh %61 : vector<8x32xf32>
    %cst_21 = arith.constant 1.000000e+00 : f32
    %63 = vector.broadcast %cst_21 : f32 to vector<8x32xf32>
    %64 = arith.subf %63, %56 : vector<8x32xf32>
    %65 = arith.mulf %64, %62 : vector<8x32xf32>
    %66 = arith.mulf %56, %19 : vector<8x32xf32>
    %67 = arith.addf %65, %66 : vector<8x32xf32>
    %68 = vector.extract_strided_slice %17 {offsets = [8, 0], sizes = [8, 96], strides = [1, 1]} : vector<64x96xf32> to vector<8x96xf32>
    %cst_22 = arith.constant dense<0.000000e+00> : vector<8x96xf32>
    %69 = tpu.matmul %42, %1, %cst_22 {dimension_numbers = #tpu.dot_dimension_numbers<[1], [0], [0], [1], [0, 0, 1, 1], [], []>} : vector<8x32xf32>, vector<32x96xf32>, vector<8x96xf32> -> vector<8x96xf32>
    %70 = vector.extract_strided_slice %68 {offsets = [0, 0], sizes = [8, 64], strides = [1, 1]} : vector<8x96xf32> to vector<8x64xf32>
    %71 = vector.extract_strided_slice %69 {offsets = [0, 0], sizes = [8, 64], strides = [1, 1]} : vector<8x96xf32> to vector<8x64xf32>
    %72 = arith.addf %70, %71 : vector<8x64xf32>
    %73 = arith.negf %72 : vector<8x64xf32>
    %74 = math.exp %73 : vector<8x64xf32>
    %cst_23 = arith.constant 1.000000e+00 : f32
    %75 = vector.broadcast %cst_23 : f32 to vector<8x64xf32>
    %76 = arith.addf %75, %74 : vector<8x64xf32>
    %77 = arith.divf %75, %76 : vector<8x64xf32>
    %78 = vector.extract_strided_slice %77 {offsets = [0, 0], sizes = [8, 32], strides = [1, 1]} : vector<8x64xf32> to vector<8x32xf32>
    %79 = vector.extract_strided_slice %77 {offsets = [0, 32], sizes = [8, 32], strides = [1, 1]} : vector<8x64xf32> to vector<8x32xf32>
    %80 = vector.extract_strided_slice %68 {offsets = [0, 64], sizes = [8, 32], strides = [1, 1]} : vector<8x96xf32> to vector<8x32xf32>
    %81 = vector.extract_strided_slice %69 {offsets = [0, 64], sizes = [8, 32], strides = [1, 1]} : vector<8x96xf32> to vector<8x32xf32>
    %82 = arith.addf %81, %5 : vector<8x32xf32>
    %83 = arith.mulf %78, %82 : vector<8x32xf32>
    %84 = arith.addf %80, %83 : vector<8x32xf32>
    %85 = math.tanh %84 : vector<8x32xf32>
    %cst_24 = arith.constant 1.000000e+00 : f32
    %86 = vector.broadcast %cst_24 : f32 to vector<8x32xf32>
    %87 = arith.subf %86, %79 : vector<8x32xf32>
    %88 = arith.mulf %87, %85 : vector<8x32xf32>
    %89 = arith.mulf %79, %42 : vector<8x32xf32>
    %90 = arith.addf %88, %89 : vector<8x32xf32>
    %cst_25 = arith.constant dense<0.000000e+00> : vector<8x96xf32>
    %91 = tpu.matmul %90, %6, %cst_25 {dimension_numbers = #tpu.dot_dimension_numbers<[1], [0], [0], [1], [0, 0, 1, 1], [], []>} : vector<8x32xf32>, vector<32x96xf32>, vector<8x96xf32> -> vector<8x96xf32>
    %92 = vector.broadcast %8 : vector<1x96xf32> to vector<8x96xf32>
    %93 = arith.addf %91, %92 : vector<8x96xf32>
    %cst_26 = arith.constant dense<0.000000e+00> : vector<8x96xf32>
    %94 = tpu.matmul %67, %7, %cst_26 {dimension_numbers = #tpu.dot_dimension_numbers<[1], [0], [0], [1], [0, 0, 1, 1], [], []>} : vector<8x32xf32>, vector<32x96xf32>, vector<8x96xf32> -> vector<8x96xf32>
    %95 = vector.extract_strided_slice %93 {offsets = [0, 0], sizes = [8, 64], strides = [1, 1]} : vector<8x96xf32> to vector<8x64xf32>
    %96 = vector.extract_strided_slice %94 {offsets = [0, 0], sizes = [8, 64], strides = [1, 1]} : vector<8x96xf32> to vector<8x64xf32>
    %97 = arith.addf %95, %96 : vector<8x64xf32>
    %98 = arith.negf %97 : vector<8x64xf32>
    %99 = math.exp %98 : vector<8x64xf32>
    %cst_27 = arith.constant 1.000000e+00 : f32
    %100 = vector.broadcast %cst_27 : f32 to vector<8x64xf32>
    %101 = arith.addf %100, %99 : vector<8x64xf32>
    %102 = arith.divf %100, %101 : vector<8x64xf32>
    %103 = vector.extract_strided_slice %102 {offsets = [0, 0], sizes = [8, 32], strides = [1, 1]} : vector<8x64xf32> to vector<8x32xf32>
    %104 = vector.extract_strided_slice %102 {offsets = [0, 32], sizes = [8, 32], strides = [1, 1]} : vector<8x64xf32> to vector<8x32xf32>
    %105 = vector.extract_strided_slice %93 {offsets = [0, 64], sizes = [8, 32], strides = [1, 1]} : vector<8x96xf32> to vector<8x32xf32>
    %106 = vector.extract_strided_slice %94 {offsets = [0, 64], sizes = [8, 32], strides = [1, 1]} : vector<8x96xf32> to vector<8x32xf32>
    %107 = arith.addf %106, %11 : vector<8x32xf32>
    %108 = arith.mulf %103, %107 : vector<8x32xf32>
    %109 = arith.addf %105, %108 : vector<8x32xf32>
    %110 = math.tanh %109 : vector<8x32xf32>
    %cst_28 = arith.constant 1.000000e+00 : f32
    %111 = vector.broadcast %cst_28 : f32 to vector<8x32xf32>
    %112 = arith.subf %111, %104 : vector<8x32xf32>
    %113 = arith.mulf %112, %110 : vector<8x32xf32>
    %114 = arith.mulf %104, %67 : vector<8x32xf32>
    %115 = arith.addf %113, %114 : vector<8x32xf32>
    %116 = vector.extract_strided_slice %17 {offsets = [16, 0], sizes = [8, 96], strides = [1, 1]} : vector<64x96xf32> to vector<8x96xf32>
    %cst_29 = arith.constant dense<0.000000e+00> : vector<8x96xf32>
    %117 = tpu.matmul %90, %1, %cst_29 {dimension_numbers = #tpu.dot_dimension_numbers<[1], [0], [0], [1], [0, 0, 1, 1], [], []>} : vector<8x32xf32>, vector<32x96xf32>, vector<8x96xf32> -> vector<8x96xf32>
    %118 = vector.extract_strided_slice %116 {offsets = [0, 0], sizes = [8, 64], strides = [1, 1]} : vector<8x96xf32> to vector<8x64xf32>
    %119 = vector.extract_strided_slice %117 {offsets = [0, 0], sizes = [8, 64], strides = [1, 1]} : vector<8x96xf32> to vector<8x64xf32>
    %120 = arith.addf %118, %119 : vector<8x64xf32>
    %121 = arith.negf %120 : vector<8x64xf32>
    %122 = math.exp %121 : vector<8x64xf32>
    %cst_30 = arith.constant 1.000000e+00 : f32
    %123 = vector.broadcast %cst_30 : f32 to vector<8x64xf32>
    %124 = arith.addf %123, %122 : vector<8x64xf32>
    %125 = arith.divf %123, %124 : vector<8x64xf32>
    %126 = vector.extract_strided_slice %125 {offsets = [0, 0], sizes = [8, 32], strides = [1, 1]} : vector<8x64xf32> to vector<8x32xf32>
    %127 = vector.extract_strided_slice %125 {offsets = [0, 32], sizes = [8, 32], strides = [1, 1]} : vector<8x64xf32> to vector<8x32xf32>
    %128 = vector.extract_strided_slice %116 {offsets = [0, 64], sizes = [8, 32], strides = [1, 1]} : vector<8x96xf32> to vector<8x32xf32>
    %129 = vector.extract_strided_slice %117 {offsets = [0, 64], sizes = [8, 32], strides = [1, 1]} : vector<8x96xf32> to vector<8x32xf32>
    %130 = arith.addf %129, %5 : vector<8x32xf32>
    %131 = arith.mulf %126, %130 : vector<8x32xf32>
    %132 = arith.addf %128, %131 : vector<8x32xf32>
    %133 = math.tanh %132 : vector<8x32xf32>
    %cst_31 = arith.constant 1.000000e+00 : f32
    %134 = vector.broadcast %cst_31 : f32 to vector<8x32xf32>
    %135 = arith.subf %134, %127 : vector<8x32xf32>
    %136 = arith.mulf %135, %133 : vector<8x32xf32>
    %137 = arith.mulf %127, %90 : vector<8x32xf32>
    %138 = arith.addf %136, %137 : vector<8x32xf32>
    %cst_32 = arith.constant dense<0.000000e+00> : vector<8x96xf32>
    %139 = tpu.matmul %138, %6, %cst_32 {dimension_numbers = #tpu.dot_dimension_numbers<[1], [0], [0], [1], [0, 0, 1, 1], [], []>} : vector<8x32xf32>, vector<32x96xf32>, vector<8x96xf32> -> vector<8x96xf32>
    %140 = vector.broadcast %8 : vector<1x96xf32> to vector<8x96xf32>
    %141 = arith.addf %139, %140 : vector<8x96xf32>
    %cst_33 = arith.constant dense<0.000000e+00> : vector<8x96xf32>
    %142 = tpu.matmul %115, %7, %cst_33 {dimension_numbers = #tpu.dot_dimension_numbers<[1], [0], [0], [1], [0, 0, 1, 1], [], []>} : vector<8x32xf32>, vector<32x96xf32>, vector<8x96xf32> -> vector<8x96xf32>
    %143 = vector.extract_strided_slice %141 {offsets = [0, 0], sizes = [8, 64], strides = [1, 1]} : vector<8x96xf32> to vector<8x64xf32>
    %144 = vector.extract_strided_slice %142 {offsets = [0, 0], sizes = [8, 64], strides = [1, 1]} : vector<8x96xf32> to vector<8x64xf32>
    %145 = arith.addf %143, %144 : vector<8x64xf32>
    %146 = arith.negf %145 : vector<8x64xf32>
    %147 = math.exp %146 : vector<8x64xf32>
    %cst_34 = arith.constant 1.000000e+00 : f32
    %148 = vector.broadcast %cst_34 : f32 to vector<8x64xf32>
    %149 = arith.addf %148, %147 : vector<8x64xf32>
    %150 = arith.divf %148, %149 : vector<8x64xf32>
    %151 = vector.extract_strided_slice %150 {offsets = [0, 0], sizes = [8, 32], strides = [1, 1]} : vector<8x64xf32> to vector<8x32xf32>
    %152 = vector.extract_strided_slice %150 {offsets = [0, 32], sizes = [8, 32], strides = [1, 1]} : vector<8x64xf32> to vector<8x32xf32>
    %153 = vector.extract_strided_slice %141 {offsets = [0, 64], sizes = [8, 32], strides = [1, 1]} : vector<8x96xf32> to vector<8x32xf32>
    %154 = vector.extract_strided_slice %142 {offsets = [0, 64], sizes = [8, 32], strides = [1, 1]} : vector<8x96xf32> to vector<8x32xf32>
    %155 = arith.addf %154, %11 : vector<8x32xf32>
    %156 = arith.mulf %151, %155 : vector<8x32xf32>
    %157 = arith.addf %153, %156 : vector<8x32xf32>
    %158 = math.tanh %157 : vector<8x32xf32>
    %cst_35 = arith.constant 1.000000e+00 : f32
    %159 = vector.broadcast %cst_35 : f32 to vector<8x32xf32>
    %160 = arith.subf %159, %152 : vector<8x32xf32>
    %161 = arith.mulf %160, %158 : vector<8x32xf32>
    %162 = arith.mulf %152, %115 : vector<8x32xf32>
    %163 = arith.addf %161, %162 : vector<8x32xf32>
    %164 = vector.extract_strided_slice %17 {offsets = [24, 0], sizes = [8, 96], strides = [1, 1]} : vector<64x96xf32> to vector<8x96xf32>
    %cst_36 = arith.constant dense<0.000000e+00> : vector<8x96xf32>
    %165 = tpu.matmul %138, %1, %cst_36 {dimension_numbers = #tpu.dot_dimension_numbers<[1], [0], [0], [1], [0, 0, 1, 1], [], []>} : vector<8x32xf32>, vector<32x96xf32>, vector<8x96xf32> -> vector<8x96xf32>
    %166 = vector.extract_strided_slice %164 {offsets = [0, 0], sizes = [8, 64], strides = [1, 1]} : vector<8x96xf32> to vector<8x64xf32>
    %167 = vector.extract_strided_slice %165 {offsets = [0, 0], sizes = [8, 64], strides = [1, 1]} : vector<8x96xf32> to vector<8x64xf32>
    %168 = arith.addf %166, %167 : vector<8x64xf32>
    %169 = arith.negf %168 : vector<8x64xf32>
    %170 = math.exp %169 : vector<8x64xf32>
    %cst_37 = arith.constant 1.000000e+00 : f32
    %171 = vector.broadcast %cst_37 : f32 to vector<8x64xf32>
    %172 = arith.addf %171, %170 : vector<8x64xf32>
    %173 = arith.divf %171, %172 : vector<8x64xf32>
    %174 = vector.extract_strided_slice %173 {offsets = [0, 0], sizes = [8, 32], strides = [1, 1]} : vector<8x64xf32> to vector<8x32xf32>
    %175 = vector.extract_strided_slice %173 {offsets = [0, 32], sizes = [8, 32], strides = [1, 1]} : vector<8x64xf32> to vector<8x32xf32>
    %176 = vector.extract_strided_slice %164 {offsets = [0, 64], sizes = [8, 32], strides = [1, 1]} : vector<8x96xf32> to vector<8x32xf32>
    %177 = vector.extract_strided_slice %165 {offsets = [0, 64], sizes = [8, 32], strides = [1, 1]} : vector<8x96xf32> to vector<8x32xf32>
    %178 = arith.addf %177, %5 : vector<8x32xf32>
    %179 = arith.mulf %174, %178 : vector<8x32xf32>
    %180 = arith.addf %176, %179 : vector<8x32xf32>
    %181 = math.tanh %180 : vector<8x32xf32>
    %cst_38 = arith.constant 1.000000e+00 : f32
    %182 = vector.broadcast %cst_38 : f32 to vector<8x32xf32>
    %183 = arith.subf %182, %175 : vector<8x32xf32>
    %184 = arith.mulf %183, %181 : vector<8x32xf32>
    %185 = arith.mulf %175, %138 : vector<8x32xf32>
    %186 = arith.addf %184, %185 : vector<8x32xf32>
    %cst_39 = arith.constant dense<0.000000e+00> : vector<8x96xf32>
    %187 = tpu.matmul %186, %6, %cst_39 {dimension_numbers = #tpu.dot_dimension_numbers<[1], [0], [0], [1], [0, 0, 1, 1], [], []>} : vector<8x32xf32>, vector<32x96xf32>, vector<8x96xf32> -> vector<8x96xf32>
    %188 = vector.broadcast %8 : vector<1x96xf32> to vector<8x96xf32>
    %189 = arith.addf %187, %188 : vector<8x96xf32>
    %cst_40 = arith.constant dense<0.000000e+00> : vector<8x96xf32>
    %190 = tpu.matmul %163, %7, %cst_40 {dimension_numbers = #tpu.dot_dimension_numbers<[1], [0], [0], [1], [0, 0, 1, 1], [], []>} : vector<8x32xf32>, vector<32x96xf32>, vector<8x96xf32> -> vector<8x96xf32>
    %191 = vector.extract_strided_slice %189 {offsets = [0, 0], sizes = [8, 64], strides = [1, 1]} : vector<8x96xf32> to vector<8x64xf32>
    %192 = vector.extract_strided_slice %190 {offsets = [0, 0], sizes = [8, 64], strides = [1, 1]} : vector<8x96xf32> to vector<8x64xf32>
    %193 = arith.addf %191, %192 : vector<8x64xf32>
    %194 = arith.negf %193 : vector<8x64xf32>
    %195 = math.exp %194 : vector<8x64xf32>
    %cst_41 = arith.constant 1.000000e+00 : f32
    %196 = vector.broadcast %cst_41 : f32 to vector<8x64xf32>
    %197 = arith.addf %196, %195 : vector<8x64xf32>
    %198 = arith.divf %196, %197 : vector<8x64xf32>
    %199 = vector.extract_strided_slice %198 {offsets = [0, 0], sizes = [8, 32], strides = [1, 1]} : vector<8x64xf32> to vector<8x32xf32>
    %200 = vector.extract_strided_slice %198 {offsets = [0, 32], sizes = [8, 32], strides = [1, 1]} : vector<8x64xf32> to vector<8x32xf32>
    %201 = vector.extract_strided_slice %189 {offsets = [0, 64], sizes = [8, 32], strides = [1, 1]} : vector<8x96xf32> to vector<8x32xf32>
    %202 = vector.extract_strided_slice %190 {offsets = [0, 64], sizes = [8, 32], strides = [1, 1]} : vector<8x96xf32> to vector<8x32xf32>
    %203 = arith.addf %202, %11 : vector<8x32xf32>
    %204 = arith.mulf %199, %203 : vector<8x32xf32>
    %205 = arith.addf %201, %204 : vector<8x32xf32>
    %206 = math.tanh %205 : vector<8x32xf32>
    %cst_42 = arith.constant 1.000000e+00 : f32
    %207 = vector.broadcast %cst_42 : f32 to vector<8x32xf32>
    %208 = arith.subf %207, %200 : vector<8x32xf32>
    %209 = arith.mulf %208, %206 : vector<8x32xf32>
    %210 = arith.mulf %200, %163 : vector<8x32xf32>
    %211 = arith.addf %209, %210 : vector<8x32xf32>
    %212 = vector.extract_strided_slice %17 {offsets = [32, 0], sizes = [8, 96], strides = [1, 1]} : vector<64x96xf32> to vector<8x96xf32>
    %cst_43 = arith.constant dense<0.000000e+00> : vector<8x96xf32>
    %213 = tpu.matmul %186, %1, %cst_43 {dimension_numbers = #tpu.dot_dimension_numbers<[1], [0], [0], [1], [0, 0, 1, 1], [], []>} : vector<8x32xf32>, vector<32x96xf32>, vector<8x96xf32> -> vector<8x96xf32>
    %214 = vector.extract_strided_slice %212 {offsets = [0, 0], sizes = [8, 64], strides = [1, 1]} : vector<8x96xf32> to vector<8x64xf32>
    %215 = vector.extract_strided_slice %213 {offsets = [0, 0], sizes = [8, 64], strides = [1, 1]} : vector<8x96xf32> to vector<8x64xf32>
    %216 = arith.addf %214, %215 : vector<8x64xf32>
    %217 = arith.negf %216 : vector<8x64xf32>
    %218 = math.exp %217 : vector<8x64xf32>
    %cst_44 = arith.constant 1.000000e+00 : f32
    %219 = vector.broadcast %cst_44 : f32 to vector<8x64xf32>
    %220 = arith.addf %219, %218 : vector<8x64xf32>
    %221 = arith.divf %219, %220 : vector<8x64xf32>
    %222 = vector.extract_strided_slice %221 {offsets = [0, 0], sizes = [8, 32], strides = [1, 1]} : vector<8x64xf32> to vector<8x32xf32>
    %223 = vector.extract_strided_slice %221 {offsets = [0, 32], sizes = [8, 32], strides = [1, 1]} : vector<8x64xf32> to vector<8x32xf32>
    %224 = vector.extract_strided_slice %212 {offsets = [0, 64], sizes = [8, 32], strides = [1, 1]} : vector<8x96xf32> to vector<8x32xf32>
    %225 = vector.extract_strided_slice %213 {offsets = [0, 64], sizes = [8, 32], strides = [1, 1]} : vector<8x96xf32> to vector<8x32xf32>
    %226 = arith.addf %225, %5 : vector<8x32xf32>
    %227 = arith.mulf %222, %226 : vector<8x32xf32>
    %228 = arith.addf %224, %227 : vector<8x32xf32>
    %229 = math.tanh %228 : vector<8x32xf32>
    %cst_45 = arith.constant 1.000000e+00 : f32
    %230 = vector.broadcast %cst_45 : f32 to vector<8x32xf32>
    %231 = arith.subf %230, %223 : vector<8x32xf32>
    %232 = arith.mulf %231, %229 : vector<8x32xf32>
    %233 = arith.mulf %223, %186 : vector<8x32xf32>
    %234 = arith.addf %232, %233 : vector<8x32xf32>
    %cst_46 = arith.constant dense<0.000000e+00> : vector<8x96xf32>
    %235 = tpu.matmul %234, %6, %cst_46 {dimension_numbers = #tpu.dot_dimension_numbers<[1], [0], [0], [1], [0, 0, 1, 1], [], []>} : vector<8x32xf32>, vector<32x96xf32>, vector<8x96xf32> -> vector<8x96xf32>
    %236 = vector.broadcast %8 : vector<1x96xf32> to vector<8x96xf32>
    %237 = arith.addf %235, %236 : vector<8x96xf32>
    %cst_47 = arith.constant dense<0.000000e+00> : vector<8x96xf32>
    %238 = tpu.matmul %211, %7, %cst_47 {dimension_numbers = #tpu.dot_dimension_numbers<[1], [0], [0], [1], [0, 0, 1, 1], [], []>} : vector<8x32xf32>, vector<32x96xf32>, vector<8x96xf32> -> vector<8x96xf32>
    %239 = vector.extract_strided_slice %237 {offsets = [0, 0], sizes = [8, 64], strides = [1, 1]} : vector<8x96xf32> to vector<8x64xf32>
    %240 = vector.extract_strided_slice %238 {offsets = [0, 0], sizes = [8, 64], strides = [1, 1]} : vector<8x96xf32> to vector<8x64xf32>
    %241 = arith.addf %239, %240 : vector<8x64xf32>
    %242 = arith.negf %241 : vector<8x64xf32>
    %243 = math.exp %242 : vector<8x64xf32>
    %cst_48 = arith.constant 1.000000e+00 : f32
    %244 = vector.broadcast %cst_48 : f32 to vector<8x64xf32>
    %245 = arith.addf %244, %243 : vector<8x64xf32>
    %246 = arith.divf %244, %245 : vector<8x64xf32>
    %247 = vector.extract_strided_slice %246 {offsets = [0, 0], sizes = [8, 32], strides = [1, 1]} : vector<8x64xf32> to vector<8x32xf32>
    %248 = vector.extract_strided_slice %246 {offsets = [0, 32], sizes = [8, 32], strides = [1, 1]} : vector<8x64xf32> to vector<8x32xf32>
    %249 = vector.extract_strided_slice %237 {offsets = [0, 64], sizes = [8, 32], strides = [1, 1]} : vector<8x96xf32> to vector<8x32xf32>
    %250 = vector.extract_strided_slice %238 {offsets = [0, 64], sizes = [8, 32], strides = [1, 1]} : vector<8x96xf32> to vector<8x32xf32>
    %251 = arith.addf %250, %11 : vector<8x32xf32>
    %252 = arith.mulf %247, %251 : vector<8x32xf32>
    %253 = arith.addf %249, %252 : vector<8x32xf32>
    %254 = math.tanh %253 : vector<8x32xf32>
    %cst_49 = arith.constant 1.000000e+00 : f32
    %255 = vector.broadcast %cst_49 : f32 to vector<8x32xf32>
    %256 = arith.subf %255, %248 : vector<8x32xf32>
    %257 = arith.mulf %256, %254 : vector<8x32xf32>
    %258 = arith.mulf %248, %211 : vector<8x32xf32>
    %259 = arith.addf %257, %258 : vector<8x32xf32>
    %260 = vector.extract_strided_slice %17 {offsets = [40, 0], sizes = [8, 96], strides = [1, 1]} : vector<64x96xf32> to vector<8x96xf32>
    %cst_50 = arith.constant dense<0.000000e+00> : vector<8x96xf32>
    %261 = tpu.matmul %234, %1, %cst_50 {dimension_numbers = #tpu.dot_dimension_numbers<[1], [0], [0], [1], [0, 0, 1, 1], [], []>} : vector<8x32xf32>, vector<32x96xf32>, vector<8x96xf32> -> vector<8x96xf32>
    %262 = vector.extract_strided_slice %260 {offsets = [0, 0], sizes = [8, 64], strides = [1, 1]} : vector<8x96xf32> to vector<8x64xf32>
    %263 = vector.extract_strided_slice %261 {offsets = [0, 0], sizes = [8, 64], strides = [1, 1]} : vector<8x96xf32> to vector<8x64xf32>
    %264 = arith.addf %262, %263 : vector<8x64xf32>
    %265 = arith.negf %264 : vector<8x64xf32>
    %266 = math.exp %265 : vector<8x64xf32>
    %cst_51 = arith.constant 1.000000e+00 : f32
    %267 = vector.broadcast %cst_51 : f32 to vector<8x64xf32>
    %268 = arith.addf %267, %266 : vector<8x64xf32>
    %269 = arith.divf %267, %268 : vector<8x64xf32>
    %270 = vector.extract_strided_slice %269 {offsets = [0, 0], sizes = [8, 32], strides = [1, 1]} : vector<8x64xf32> to vector<8x32xf32>
    %271 = vector.extract_strided_slice %269 {offsets = [0, 32], sizes = [8, 32], strides = [1, 1]} : vector<8x64xf32> to vector<8x32xf32>
    %272 = vector.extract_strided_slice %260 {offsets = [0, 64], sizes = [8, 32], strides = [1, 1]} : vector<8x96xf32> to vector<8x32xf32>
    %273 = vector.extract_strided_slice %261 {offsets = [0, 64], sizes = [8, 32], strides = [1, 1]} : vector<8x96xf32> to vector<8x32xf32>
    %274 = arith.addf %273, %5 : vector<8x32xf32>
    %275 = arith.mulf %270, %274 : vector<8x32xf32>
    %276 = arith.addf %272, %275 : vector<8x32xf32>
    %277 = math.tanh %276 : vector<8x32xf32>
    %cst_52 = arith.constant 1.000000e+00 : f32
    %278 = vector.broadcast %cst_52 : f32 to vector<8x32xf32>
    %279 = arith.subf %278, %271 : vector<8x32xf32>
    %280 = arith.mulf %279, %277 : vector<8x32xf32>
    %281 = arith.mulf %271, %234 : vector<8x32xf32>
    %282 = arith.addf %280, %281 : vector<8x32xf32>
    %cst_53 = arith.constant dense<0.000000e+00> : vector<8x96xf32>
    %283 = tpu.matmul %282, %6, %cst_53 {dimension_numbers = #tpu.dot_dimension_numbers<[1], [0], [0], [1], [0, 0, 1, 1], [], []>} : vector<8x32xf32>, vector<32x96xf32>, vector<8x96xf32> -> vector<8x96xf32>
    %284 = vector.broadcast %8 : vector<1x96xf32> to vector<8x96xf32>
    %285 = arith.addf %283, %284 : vector<8x96xf32>
    %cst_54 = arith.constant dense<0.000000e+00> : vector<8x96xf32>
    %286 = tpu.matmul %259, %7, %cst_54 {dimension_numbers = #tpu.dot_dimension_numbers<[1], [0], [0], [1], [0, 0, 1, 1], [], []>} : vector<8x32xf32>, vector<32x96xf32>, vector<8x96xf32> -> vector<8x96xf32>
    %287 = vector.extract_strided_slice %285 {offsets = [0, 0], sizes = [8, 64], strides = [1, 1]} : vector<8x96xf32> to vector<8x64xf32>
    %288 = vector.extract_strided_slice %286 {offsets = [0, 0], sizes = [8, 64], strides = [1, 1]} : vector<8x96xf32> to vector<8x64xf32>
    %289 = arith.addf %287, %288 : vector<8x64xf32>
    %290 = arith.negf %289 : vector<8x64xf32>
    %291 = math.exp %290 : vector<8x64xf32>
    %cst_55 = arith.constant 1.000000e+00 : f32
    %292 = vector.broadcast %cst_55 : f32 to vector<8x64xf32>
    %293 = arith.addf %292, %291 : vector<8x64xf32>
    %294 = arith.divf %292, %293 : vector<8x64xf32>
    %295 = vector.extract_strided_slice %294 {offsets = [0, 0], sizes = [8, 32], strides = [1, 1]} : vector<8x64xf32> to vector<8x32xf32>
    %296 = vector.extract_strided_slice %294 {offsets = [0, 32], sizes = [8, 32], strides = [1, 1]} : vector<8x64xf32> to vector<8x32xf32>
    %297 = vector.extract_strided_slice %285 {offsets = [0, 64], sizes = [8, 32], strides = [1, 1]} : vector<8x96xf32> to vector<8x32xf32>
    %298 = vector.extract_strided_slice %286 {offsets = [0, 64], sizes = [8, 32], strides = [1, 1]} : vector<8x96xf32> to vector<8x32xf32>
    %299 = arith.addf %298, %11 : vector<8x32xf32>
    %300 = arith.mulf %295, %299 : vector<8x32xf32>
    %301 = arith.addf %297, %300 : vector<8x32xf32>
    %302 = math.tanh %301 : vector<8x32xf32>
    %cst_56 = arith.constant 1.000000e+00 : f32
    %303 = vector.broadcast %cst_56 : f32 to vector<8x32xf32>
    %304 = arith.subf %303, %296 : vector<8x32xf32>
    %305 = arith.mulf %304, %302 : vector<8x32xf32>
    %306 = arith.mulf %296, %259 : vector<8x32xf32>
    %307 = arith.addf %305, %306 : vector<8x32xf32>
    %308 = vector.extract_strided_slice %17 {offsets = [48, 0], sizes = [8, 96], strides = [1, 1]} : vector<64x96xf32> to vector<8x96xf32>
    %cst_57 = arith.constant dense<0.000000e+00> : vector<8x96xf32>
    %309 = tpu.matmul %282, %1, %cst_57 {dimension_numbers = #tpu.dot_dimension_numbers<[1], [0], [0], [1], [0, 0, 1, 1], [], []>} : vector<8x32xf32>, vector<32x96xf32>, vector<8x96xf32> -> vector<8x96xf32>
    %310 = vector.extract_strided_slice %308 {offsets = [0, 0], sizes = [8, 64], strides = [1, 1]} : vector<8x96xf32> to vector<8x64xf32>
    %311 = vector.extract_strided_slice %309 {offsets = [0, 0], sizes = [8, 64], strides = [1, 1]} : vector<8x96xf32> to vector<8x64xf32>
    %312 = arith.addf %310, %311 : vector<8x64xf32>
    %313 = arith.negf %312 : vector<8x64xf32>
    %314 = math.exp %313 : vector<8x64xf32>
    %cst_58 = arith.constant 1.000000e+00 : f32
    %315 = vector.broadcast %cst_58 : f32 to vector<8x64xf32>
    %316 = arith.addf %315, %314 : vector<8x64xf32>
    %317 = arith.divf %315, %316 : vector<8x64xf32>
    %318 = vector.extract_strided_slice %317 {offsets = [0, 0], sizes = [8, 32], strides = [1, 1]} : vector<8x64xf32> to vector<8x32xf32>
    %319 = vector.extract_strided_slice %317 {offsets = [0, 32], sizes = [8, 32], strides = [1, 1]} : vector<8x64xf32> to vector<8x32xf32>
    %320 = vector.extract_strided_slice %308 {offsets = [0, 64], sizes = [8, 32], strides = [1, 1]} : vector<8x96xf32> to vector<8x32xf32>
    %321 = vector.extract_strided_slice %309 {offsets = [0, 64], sizes = [8, 32], strides = [1, 1]} : vector<8x96xf32> to vector<8x32xf32>
    %322 = arith.addf %321, %5 : vector<8x32xf32>
    %323 = arith.mulf %318, %322 : vector<8x32xf32>
    %324 = arith.addf %320, %323 : vector<8x32xf32>
    %325 = math.tanh %324 : vector<8x32xf32>
    %cst_59 = arith.constant 1.000000e+00 : f32
    %326 = vector.broadcast %cst_59 : f32 to vector<8x32xf32>
    %327 = arith.subf %326, %319 : vector<8x32xf32>
    %328 = arith.mulf %327, %325 : vector<8x32xf32>
    %329 = arith.mulf %319, %282 : vector<8x32xf32>
    %330 = arith.addf %328, %329 : vector<8x32xf32>
    %cst_60 = arith.constant dense<0.000000e+00> : vector<8x96xf32>
    %331 = tpu.matmul %330, %6, %cst_60 {dimension_numbers = #tpu.dot_dimension_numbers<[1], [0], [0], [1], [0, 0, 1, 1], [], []>} : vector<8x32xf32>, vector<32x96xf32>, vector<8x96xf32> -> vector<8x96xf32>
    %332 = vector.broadcast %8 : vector<1x96xf32> to vector<8x96xf32>
    %333 = arith.addf %331, %332 : vector<8x96xf32>
    %cst_61 = arith.constant dense<0.000000e+00> : vector<8x96xf32>
    %334 = tpu.matmul %307, %7, %cst_61 {dimension_numbers = #tpu.dot_dimension_numbers<[1], [0], [0], [1], [0, 0, 1, 1], [], []>} : vector<8x32xf32>, vector<32x96xf32>, vector<8x96xf32> -> vector<8x96xf32>
    %335 = vector.extract_strided_slice %333 {offsets = [0, 0], sizes = [8, 64], strides = [1, 1]} : vector<8x96xf32> to vector<8x64xf32>
    %336 = vector.extract_strided_slice %334 {offsets = [0, 0], sizes = [8, 64], strides = [1, 1]} : vector<8x96xf32> to vector<8x64xf32>
    %337 = arith.addf %335, %336 : vector<8x64xf32>
    %338 = arith.negf %337 : vector<8x64xf32>
    %339 = math.exp %338 : vector<8x64xf32>
    %cst_62 = arith.constant 1.000000e+00 : f32
    %340 = vector.broadcast %cst_62 : f32 to vector<8x64xf32>
    %341 = arith.addf %340, %339 : vector<8x64xf32>
    %342 = arith.divf %340, %341 : vector<8x64xf32>
    %343 = vector.extract_strided_slice %342 {offsets = [0, 0], sizes = [8, 32], strides = [1, 1]} : vector<8x64xf32> to vector<8x32xf32>
    %344 = vector.extract_strided_slice %342 {offsets = [0, 32], sizes = [8, 32], strides = [1, 1]} : vector<8x64xf32> to vector<8x32xf32>
    %345 = vector.extract_strided_slice %333 {offsets = [0, 64], sizes = [8, 32], strides = [1, 1]} : vector<8x96xf32> to vector<8x32xf32>
    %346 = vector.extract_strided_slice %334 {offsets = [0, 64], sizes = [8, 32], strides = [1, 1]} : vector<8x96xf32> to vector<8x32xf32>
    %347 = arith.addf %346, %11 : vector<8x32xf32>
    %348 = arith.mulf %343, %347 : vector<8x32xf32>
    %349 = arith.addf %345, %348 : vector<8x32xf32>
    %350 = math.tanh %349 : vector<8x32xf32>
    %cst_63 = arith.constant 1.000000e+00 : f32
    %351 = vector.broadcast %cst_63 : f32 to vector<8x32xf32>
    %352 = arith.subf %351, %344 : vector<8x32xf32>
    %353 = arith.mulf %352, %350 : vector<8x32xf32>
    %354 = arith.mulf %344, %307 : vector<8x32xf32>
    %355 = arith.addf %353, %354 : vector<8x32xf32>
    %356 = vector.extract_strided_slice %17 {offsets = [56, 0], sizes = [8, 96], strides = [1, 1]} : vector<64x96xf32> to vector<8x96xf32>
    %cst_64 = arith.constant dense<0.000000e+00> : vector<8x96xf32>
    %357 = tpu.matmul %330, %1, %cst_64 {dimension_numbers = #tpu.dot_dimension_numbers<[1], [0], [0], [1], [0, 0, 1, 1], [], []>} : vector<8x32xf32>, vector<32x96xf32>, vector<8x96xf32> -> vector<8x96xf32>
    %358 = vector.extract_strided_slice %356 {offsets = [0, 0], sizes = [8, 64], strides = [1, 1]} : vector<8x96xf32> to vector<8x64xf32>
    %359 = vector.extract_strided_slice %357 {offsets = [0, 0], sizes = [8, 64], strides = [1, 1]} : vector<8x96xf32> to vector<8x64xf32>
    %360 = arith.addf %358, %359 : vector<8x64xf32>
    %361 = arith.negf %360 : vector<8x64xf32>
    %362 = math.exp %361 : vector<8x64xf32>
    %cst_65 = arith.constant 1.000000e+00 : f32
    %363 = vector.broadcast %cst_65 : f32 to vector<8x64xf32>
    %364 = arith.addf %363, %362 : vector<8x64xf32>
    %365 = arith.divf %363, %364 : vector<8x64xf32>
    %366 = vector.extract_strided_slice %365 {offsets = [0, 0], sizes = [8, 32], strides = [1, 1]} : vector<8x64xf32> to vector<8x32xf32>
    %367 = vector.extract_strided_slice %365 {offsets = [0, 32], sizes = [8, 32], strides = [1, 1]} : vector<8x64xf32> to vector<8x32xf32>
    %368 = vector.extract_strided_slice %356 {offsets = [0, 64], sizes = [8, 32], strides = [1, 1]} : vector<8x96xf32> to vector<8x32xf32>
    %369 = vector.extract_strided_slice %357 {offsets = [0, 64], sizes = [8, 32], strides = [1, 1]} : vector<8x96xf32> to vector<8x32xf32>
    %370 = arith.addf %369, %5 : vector<8x32xf32>
    %371 = arith.mulf %366, %370 : vector<8x32xf32>
    %372 = arith.addf %368, %371 : vector<8x32xf32>
    %373 = math.tanh %372 : vector<8x32xf32>
    %cst_66 = arith.constant 1.000000e+00 : f32
    %374 = vector.broadcast %cst_66 : f32 to vector<8x32xf32>
    %375 = arith.subf %374, %367 : vector<8x32xf32>
    %376 = arith.mulf %375, %373 : vector<8x32xf32>
    %377 = arith.mulf %367, %330 : vector<8x32xf32>
    %378 = arith.addf %376, %377 : vector<8x32xf32>
    %cst_67 = arith.constant dense<0.000000e+00> : vector<8x96xf32>
    %379 = tpu.matmul %378, %6, %cst_67 {dimension_numbers = #tpu.dot_dimension_numbers<[1], [0], [0], [1], [0, 0, 1, 1], [], []>} : vector<8x32xf32>, vector<32x96xf32>, vector<8x96xf32> -> vector<8x96xf32>
    %380 = vector.broadcast %8 : vector<1x96xf32> to vector<8x96xf32>
    %381 = arith.addf %379, %380 : vector<8x96xf32>
    %cst_68 = arith.constant dense<0.000000e+00> : vector<8x96xf32>
    %382 = tpu.matmul %355, %7, %cst_68 {dimension_numbers = #tpu.dot_dimension_numbers<[1], [0], [0], [1], [0, 0, 1, 1], [], []>} : vector<8x32xf32>, vector<32x96xf32>, vector<8x96xf32> -> vector<8x96xf32>
    %383 = vector.extract_strided_slice %381 {offsets = [0, 0], sizes = [8, 64], strides = [1, 1]} : vector<8x96xf32> to vector<8x64xf32>
    %384 = vector.extract_strided_slice %382 {offsets = [0, 0], sizes = [8, 64], strides = [1, 1]} : vector<8x96xf32> to vector<8x64xf32>
    %385 = arith.addf %383, %384 : vector<8x64xf32>
    %386 = arith.negf %385 : vector<8x64xf32>
    %387 = math.exp %386 : vector<8x64xf32>
    %cst_69 = arith.constant 1.000000e+00 : f32
    %388 = vector.broadcast %cst_69 : f32 to vector<8x64xf32>
    %389 = arith.addf %388, %387 : vector<8x64xf32>
    %390 = arith.divf %388, %389 : vector<8x64xf32>
    %391 = vector.extract_strided_slice %390 {offsets = [0, 0], sizes = [8, 32], strides = [1, 1]} : vector<8x64xf32> to vector<8x32xf32>
    %392 = vector.extract_strided_slice %390 {offsets = [0, 32], sizes = [8, 32], strides = [1, 1]} : vector<8x64xf32> to vector<8x32xf32>
    %393 = vector.extract_strided_slice %381 {offsets = [0, 64], sizes = [8, 32], strides = [1, 1]} : vector<8x96xf32> to vector<8x32xf32>
    %394 = vector.extract_strided_slice %382 {offsets = [0, 64], sizes = [8, 32], strides = [1, 1]} : vector<8x96xf32> to vector<8x32xf32>
    %395 = arith.addf %394, %11 : vector<8x32xf32>
    %396 = arith.mulf %391, %395 : vector<8x32xf32>
    %397 = arith.addf %393, %396 : vector<8x32xf32>
    %398 = math.tanh %397 : vector<8x32xf32>
    %cst_70 = arith.constant 1.000000e+00 : f32
    %399 = vector.broadcast %cst_70 : f32 to vector<8x32xf32>
    %400 = arith.subf %399, %392 : vector<8x32xf32>
    %401 = arith.mulf %400, %398 : vector<8x32xf32>
    %402 = arith.mulf %392, %355 : vector<8x32xf32>
    %403 = arith.addf %401, %402 : vector<8x32xf32>
    %cst_71 = arith.constant 0.000000e+00 : f32
    %404 = vector.broadcast %cst_71 : f32 to vector<8x32xf32>
    %405 = arith.maximumf %403, %404 : vector<8x32xf32>
    %cst_72 = arith.constant dense<0.000000e+00> : vector<8x8xf32>
    %406 = tpu.matmul %405, %12, %cst_72 {dimension_numbers = #tpu.dot_dimension_numbers<[1], [0], [0], [1], [0, 0, 1, 1], [], []>} : vector<8x32xf32>, vector<32x8xf32>, vector<8x8xf32> -> vector<8x8xf32>
    %407 = vector.broadcast %13 : vector<1x8xf32> to vector<8x8xf32>
    %408 = arith.addf %406, %407 : vector<8x8xf32>
    %c0_73 = arith.constant 0 : index
    %c0_74 = arith.constant 0 : index
    %409 = vector.load %arg3[%c0_73, %c0_74] : memref<8x8xf32, #tpu.memory_space<vmem>>, vector<8x8xf32>
    tpu.vector_store %arg3[%c0_73, %c0_74], %408 {strides = array<i32>} : memref<8x8xf32, #tpu.memory_space<vmem>>, vector<8x8xf32>,
    return
  }
  func.func @transform_0(%arg0: i32) -> (i32, i32) {
    %c0_i32 = arith.constant 0 : i32
    %c0_i32_0 = arith.constant 0 : i32
    %c0_i32_1 = arith.constant 0 : i32
    return %c0_i32, %c0_i32_0 : i32, i32
  }
  func.func @transform_1(%arg0: i32) -> (i32, i32) {
    %c0_i32 = arith.constant 0 : i32
    %c0_i32_0 = arith.constant 0 : i32
    %c0_i32_1 = arith.constant 0 : i32
    return %c0_i32, %c0_i32_0 : i32, i32
  }
  func.func @transform_2(%arg0: i32) -> (i32, i32) {
    %c0_i32 = arith.constant 0 : i32
    %c0_i32_0 = arith.constant 0 : i32
    %c0_i32_1 = arith.constant 0 : i32
    return %c0_i32, %c0_i32_0 : i32, i32
  }
}

</mosaic_0001>

<bundles_post_ra>
// kernel: _gru_forward_impl.1
= control target key start
LH: loop header
LB: loop body
LE: loop exit
PB: predicated region body
PF: predicated region fallthrough
CT: control target
= control target key end

     0   :  { %vm49_vm0 = vcmask 130048   ;;  %v3232_v3 = vmov 0.0|0.0   ;;  %vm3233_vm1 = vmmov 0   ;;  %v3234_v10 = vmov 0.0   ;;  %s3235_s25 = smov 96   ;;  %s3730_s0 = inlined_call_operand.vmem [shape: f32[64,16], index: 0, kind: input, shape index: {}]   ;;  %s3731_s1 = inlined_call_operand.vmem [shape: f32[168,128], index: 1, kind: input, shape index: {}]   ;;  %s3732_s2 = inlined_call_operand.hbm [shape: f32[8,8], index: 2, kind: output, shape index: {}]  }
   0x1   :  { %v12_v0 = vld [vmem:[%s3731_s1] sm:$0xff]  ;;  %v13_v1 = vld [vmem:[%s3731_s1 + $0x8] sm:$0xff]  ;;  %v14_v2 = vld [vmem:[%s3731_s1 + $0x10] sm:$0xff]  ;;  %2954 = vmatprep.subr.bf16.mxu1 %v3232_v3  ;;  %2683 = vmatprep.mubr.msk.f32.mxu1 %vm3233_vm1, %v3234_v10 }
   0x2   :  { %v2950_v4 = vpack.c.bf16 %v13_v1, %v12_v0  ;;  %v15_v5 = vld [vmem:[%s3731_s1 + $0x18] sm:$0xff]  ;;  %v41_v6 = vld [vmem:[%s3730_s0] sm:$0xff]  ;;  %v17_v9 = vld [vmem:[%s3731_s1 + $0x28] sm:$0xff] }
   0x3   :  { %v3269_v7 = vpack.c.bf16 %v15_v5, %v14_v2  ;;  %2663 = vmatprep.mubr.msk.f32.mxu0 %vm49_vm0, %v41_v6  ;;  %v16_v8 = vld [vmem:[%s3731_s1 + $0x20] sm:$0xff]  ;;  %v3283_v11 = vld [vmem:[%s3731_s1 + $0x30] ss:$0 sm:$0xff] }
   0x4   :  { %2951 = vmatprep.subr.bf16.mxu0 %v2950_v4  ;;  %261 = vrot.lane.b32.xlu0 %v3283_v11, %s3235_s25 }
   0x5   :  { %7 = vsyncpa [#allocation3], 0  ;;  %2956 = vmatpush3.bf16.msra.mxu1 %v3269_v7  ;;  %2953 = vmatpush3.bf16.msra.mxu0 %v2950_v4  ;;  %v42_v12 = vld [vmem:[%s3730_s0 + $0x8] sm:$0xff]  ;;  %v3291_v13 = vpack.c.bf16 %v17_v9, %v16_v8  ;;  %s3236_s28 = smov 64   ;;  %v43_v30 = vld [vmem:[%s3730_s0 + $0x10] sm:$0xff]  ;;  %vm179_vm2 = vcmask 261120  }
   0x6   :  { %2957 = vmatprep.subr.bf16.mxu1 %v3232_v3  ;;  %2966 = vmatprep.subr.bf16.mxu0 %v3232_v3  ;;  %v44_v31 = vld [vmem:[%s3730_s0 + $0x18] sm:$0xff]  ;;  %v45_v32 = vld [vmem:[%s3730_s0 + $0x20] sm:$0xff]  ;;  %v46_v35 = vld [vmem:[%s3730_s0 + $0x28] sm:$0xff]  ;;  %s3237_s17 = smov [#allocation2]   ;;  %vm2458_vm3 = vcmask 64512  }
   0x7   :  { %v27_v33 = vld [vmem:[%s3731_s1 + $0x58] sm:$0xff]  ;;  %v28_v34 = vld [vmem:[%s3731_s1 + $0x60] sm:$0xff]  ;;  %v29_v37 = vld [vmem:[%s3731_s1 + $0x68] sm:$0xff]  ;;  %s2466_s18 = sshll.u32 %s3237_s17, 4  ;;  %s2467_s18 = int_to_ptr.vmem [resolvable:$true] %s2466_s18 }
   0x8   :  { %2664 = vmatmul.mubr.msk.f32.vlgmr.msra.gmra.mrb[0].mxu0 %vm49_vm0, %v42_v12  ;;  %v3329_v36 = vpack.c.bf16 %v28_v34, %v27_v33  ;;  %v30_v38 = vld [vmem:[%s3731_s1 + $0x70] sm:$0xff]  ;;  %v23_v39 = vld [vmem:[%s3731_s1 + $0x38] sm:$0xff]  ;;  %v24_v40 = vld [vmem:[%s3731_s1 + $0x40] sm:$0xff]  ;;  %s3208_s19 = scalar_lea.vmem %s2467_s18, 128  ;;  %p3213_p1 = scmp.lt.s32.totalorder %s2467_s18, %s2467_s18 }
   0x9   :  { %2959 = vmatpush3.bf16.msra.mxu1 %v3291_v13  ;;  %2666 = vmatprep.mubr.msk.f32.mxu0 %vm49_vm0, %v43_v30  ;;  %v47_v41 = vld [vmem:[%s3730_s0 + $0x30] sm:$0xff]  ;;  %v3348_v42 = vpack.c.bf16 %v30_v38, %v29_v37  ;;  %v3350_v43 = vpack.c.bf16 %v24_v40, %v23_v39  ;;  %v25_v44 = vld [vmem:[%s3731_s1 + $0x48] sm:$0xff]  ;;  %v48_v47 = vld [vmem:[%s3730_s0 + $0x38] sm:$0xff]  ;;  %p3209_p0 = scmp.ne.s32.totalorder %s2467_s18, %s3208_s19  ;;  %p3214_p2 = scmp.lt.s32.totalorder %s3208_s19, %s3208_s19 }
   0xa   :  { %2960 = vmatprep.subr.bf16.mxu1 %v3232_v3  ;;  %2968 = vmatpush3.bf16.msra.mxu0 %v3329_v36  ;;  %v26_v45 = vld [vmem:[%s3731_s1 + $0x50] sm:$0xff]  ;;  %v3386_v51 = vld [vmem:[%s3731_s1 + $0x78] ss:$0 sm:$0xff] }
   0xb   :  { %2969 = vmatprep.subr.bf16.mxu0 %v3232_v3  ;;  %v3361_v46 = vpack.c.bf16 %v26_v45, %v25_v44  ;;  %p3215_p3 = por %p3214_p2, %p3213_p1 }
   0xc   :  { %2684 = vmatmul.mubr.f32.vlgmr.msra.gmra.mrb[0].mxu1 %v3234_v10  ;;  %2667 = vmatmul.mubr.msk.f32.gmra.mrb[2].mxu0 %vm49_vm0, %v44_v31 }
   0xd   :  { %2694 = vmatprep.mubr.msk.f32.mxu1 %vm3233_vm1, %v3234_v10  ;;  %2669 = vmatprep.mubr.msk.f32.mxu0 %vm49_vm0, %v45_v32  ;;  %p3216_p4 = pnand %p3215_p3, %p3209_p0 }
   0xe   :  { %2962 = vmatpush3.bf16.msra.mxu1 %v3350_v43  ;;  %2971 = vmatpush3.bf16.msra.mxu0 %v3348_v42 }
   0xf   :  { %2963 = vmatprep.subr.bf16.mxu1 %v3232_v3  ;;  %2978 = vmatprep.subr.bf16.mxu0 %v3232_v3 }
  0x10   :  { %2670 = vmatmul.mubr.msk.f32.gmra.mrb[4].mxu0 %vm49_vm0, %v46_v35 }
  0x11   :  { %2672 = vmatprep.mubr.msk.f32.mxu0 %vm49_vm0, %v47_v41 }
  0x12   :  { %2965 = vmatpush3.bf16.msra.mxu1 %v3361_v46 }
  0x13   :  { %2972 = vmatprep.subr.bf16.mxu1 %v3232_v3 }
  0x14   :  { %2673 = vmatmul.mubr.msk.f32.gmra.mrb[6].mxu0 %vm49_vm0, %v48_v47 }
  0x15   :  { %2705 = vmatprep.mubr.msk.f32.mxu0 %vm3233_vm1, %v3234_v10 }
  0x18   :  { %2706 = vmatmul.mubr.f32.vlgmr.msra.gmra.mrb[8].mxu0 %v3234_v10 }
  0x19   :  { %2980 = vmatpush3.bf16.msra.mxu0 %v3350_v43  ;;  %2727 = vmatprep.mubr.msk.f32.mxu0 %vm3233_vm1, %v3234_v10 }
  0x1a   :  { %2981 = vmatprep.subr.bf16.mxu0 %v3232_v3 }
  0x1d   :  { %2983 = vmatpush3.bf16.msra.mxu0 %v3361_v46 }
  0x1e   :  { %2990 = vmatprep.subr.bf16.mxu0 %v3232_v3 }
  0x76   :  { %v3303_v16 = vpop.permute.xlu0 %261 }
  0xdb   :  { %v3301_v14 = vpop.f32.mrb[0].mxu0 }
  0xdc   :  { %v140_v15 = vpop.f32.mrb[1].mxu0 }
  0xdd   :  { %v141_v20 = vadd.f32 %v3283_v11, %v140_v15 }
  0xdf   :  { %v249_v17 = vpop.f32.mrb[0].mxu1  ;;  %v3394_v55 = vpop.f32.mrb[2].mxu0 }
  0xe0   :  { %v264_v18 = vadd.f32 %v3303_v16, %v249_v17  ;;  %v2685_v19 = vpop.f32.mrb[1].mxu1  ;;  %v253_v21 = vadd.f32 %v249_v17, %v141_v20  ;;  %v3396_v56 = vpop.f32.mrb[3].mxu0 }
  0xe2   :  { %266 = vrot.lane.b32.xlu0 %v264_v18, %s3236_s28  ;;  %v2484_v22 = vmul.f32 -1.442695, %v253_v21 }
  0xe3   :  { %v3398_v57 = vpop.f32.mrb[4].mxu0 }
  0xe4   :  { %3110 = vpow2.f32 %v2484_v22  ;;  %v3400_v58 = vpop.f32.mrb[5].mxu0  ;;  %v146_v22 = vadd.f32 %v3301_v14, %v3283_v11 }
  0xe7   :  { %v3402_v59 = vpop.f32.mrb[6].mxu0 }
  0xe8   :  { %v3404_v60 = vpop.f32.mrb[7].mxu0 }
  0xeb   :  { %v425_v61 = vpop.f32.mrb[8].mxu0 }
  0xec   :  { %v2707_v62 = vpop.f32.mrb[9].mxu0 }
  0xee   :  { %v3111_v23 = vpop.eup %3110 }
  0xef   :  { %v257_v24 = vadd.f32 1.0, %v3111_v23 }
  0xf1   :  { %3112 = vrcp.f32 %v257_v24 }
  0xfb   :  { %v3113_v25 = vpop.eup %3112 }
  0xfc   :  { %v276_v49 = vsub.f32 1.0, %v3113_v25  ;;  %v282_v52 = vmul.f32 0.0, %v3113_v25 }
 0x154   :  { %v267_v26 = vpop.permute.xlu0 %266 }
 0x155   :  { %v269_v27 = vmul.f32 %v3113_v25, %v267_v26 }
 0x157   :  { %271 = vrot.lane.b32.xlu1 %v269_v27, %s3236_s28 }
 0x1c9   :  { %v272_v28 = vpop.permute.xlu1 %271 }
 0x1ca   :  { %v274_v29 = vadd.f32 %v272_v28, %v141_v20 }
 0x1cc   :  { %3114 = vtanh.f32 %v274_v29 }
 0x1d6   :  { %v3115_v48 = vpop.eup %3114 }
 0x1d7   :  { %278 = vrot.lane.b32.xlu1 %v3115_v48, %s3235_s25 }
 0x1db   :  { %437 = vrot.lane.b32.xlu1 %v3386_v51, %s3235_s25 }
 0x249   :  { %v279_v50 = vpop.permute.xlu1 %278 }
 0x24a   :  { %v281_v53 = vmul.f32 %v279_v50, %v276_v49 }
 0x24c   :  { %v3390_v54 = vadd.f32 %v282_v52, %v281_v53 }
 0x24d   :  { %v3406_v63 = vpop.permute.xlu1 %437 }
 0x24e   :  { %285 = vrot.lane.b32.xlu0 %v3390_v54, %s3235_s25  ;;  %v440_v0 = vadd.f32 %v3406_v63, %v425_v61 }
 0x250   :  { %442 = vrot.lane.b32.xlu1 %v440_v0, %s3236_s28 }
 0x2c0   :  { %v286_v1 = vpop.permute.xlu0 %285 }
 0x2c1   :  { %2695 = vmatmul.mubr.msk.f32.vlgmr.msra.gmra.mrb[2].mxu1 %vm179_vm2, %v286_v1 }
 0x2c2   :  { %2974 = vmatpush3.bf16.msra.mxu1 %v3269_v7  ;;  %2716 = vmatprep.mubr.msk.f32.mxu1 %vm3233_vm1, %v3234_v10  ;;  %v443_v19 = vpop.permute.xlu1 %442 }
 0x2c3   :  { %2975 = vmatprep.subr.bf16.mxu1 %v3232_v3 }
 0x2c6   :  { %2977 = vmatpush3.bf16.msra.mxu1 %v3291_v13 }
 0x2c7   :  { %2984 = vmatprep.subr.bf16.mxu1 %v3232_v3 }
 0x2c9   :  { %2717 = vmatmul.mubr.msk.f32.vlgmr.msra.gmra.mrb[4].mxu1 %vm179_vm2, %v286_v1 }
 0x2ca   :  { %2986 = vmatpush3.bf16.msra.mxu1 %v3329_v36  ;;  %2738 = vmatprep.mubr.msk.f32.mxu1 %vm3233_vm1, %v3234_v10 }
 0x2cb   :  { %2987 = vmatprep.subr.bf16.mxu1 %v3232_v3 }
 0x2ce   :  { %2989 = vmatpush3.bf16.msra.mxu1 %v3348_v42 }
 0x2cf   :  { %2996 = vmatprep.subr.bf16.mxu1 %v3232_v3 }
 0x394   :  { %v355_v2 = vpop.f32.mrb[2].mxu1 }
 0x395   :  { %v356_v4 = vadd.f32 %v3386_v51, %v355_v2  ;;  %v2696_v5 = vpop.f32.mrb[3].mxu1 }
 0x397   :  { %v429_v6 = vadd.f32 %v425_v61, %v356_v4 }
 0x399   :  { %v2486_v8 = vmul.f32 -1.442695, %v429_v6 }
 0x39b   :  { %3116 = vpow2.f32 %v2486_v8 }
 0x39c   :  { %v526_v9 = vpop.f32.mrb[4].mxu1 }
 0x39d   :  { %v537_v12 = vadd.f32 %v526_v9, %v3303_v16  ;;  %v2718_v15 = vpop.f32.mrb[5].mxu1  ;;  %v530_v23 = vadd.f32 %v526_v9, %v146_v22 }
 0x39f   :  { %539 = vrot.lane.b32.xlu0 %v537_v12, %s3236_s28  ;;  %v2488_v24 = vmul.f32 -1.442695, %v530_v23 }
 0x3a5   :  { %v3117_v17 = vpop.eup %3116 }
 0x3a6   :  { %v433_v18 = vadd.f32 1.0, %v3117_v17 }
 0x3a8   :  { %3118 = vrcp.f32 %v433_v18  ;;  %v151_v18 = vadd.f32 %v3283_v11, %v3396_v56 }
 0x3a9   :  { %3120 = vpow2.f32 %v2488_v24 }
 0x3b2   :  { %v3119_v20 = vpop.eup %3118 }
 0x3b3   :  { %v445_v21 = vmul.f32 %v3119_v20, %v443_v19  ;;  %v3121_v25 = vpop.eup %3120  ;;  %v452_v35 = vsub.f32 1.0, %v3119_v20  ;;  %v458_v38 = vmul.f32 0.0, %v3119_v20 }
 0x3b4   :  { %v534_v26 = vadd.f32 1.0, %v3121_v25 }
 0x3b5   :  { %447 = vrot.lane.b32.xlu1 %v445_v21, %s3236_s28 }
 0x3b6   :  { %3122 = vrcp.f32 %v534_v26 }
 0x3c0   :  { %v3123_v27 = vpop.eup %3122 }
 0x3c1   :  { %v549_v41 = vsub.f32 1.0, %v3123_v27  ;;  %v555_v45 = vmul.f32 %v3123_v27, %v3390_v54 }
 0x411   :  { %v540_v28 = vpop.permute.xlu0 %539 }
 0x412   :  { %v542_v29 = vmul.f32 %v3123_v27, %v540_v28 }
 0x414   :  { %544 = vrot.lane.b32.xlu0 %v542_v29, %s3236_s28 }
 0x427   :  { %v448_v30 = vpop.permute.xlu1 %447 }
 0x428   :  { %v450_v31 = vadd.f32 %v448_v30, %v356_v4 }
 0x42a   :  { %3124 = vtanh.f32 %v450_v31 }
 0x434   :  { %v3125_v32 = vpop.eup %3124 }
 0x435   :  { %454 = vrot.lane.b32.xlu1 %v3125_v32, %s3235_s25 }
 0x486   :  { %v545_v33 = vpop.permute.xlu0 %544 }
 0x487   :  { %v547_v34 = vadd.f32 %v545_v33, %v146_v22 }
 0x489   :  { %3126 = vtanh.f32 %v547_v34 }
 0x493   :  { %v3127_v14 = vpop.eup %3126 }
 0x494   :  { %551 = vrot.lane.b32.xlu0 %v3127_v14, %s3235_s25 }
 0x4a7   :  { %v455_v37 = vpop.permute.xlu1 %454 }
 0x4a8   :  { %v457_v39 = vmul.f32 %v455_v37, %v452_v35 }
 0x4aa   :  { %v3433_v40 = vadd.f32 %v458_v38, %v457_v39 }
 0x4ac   :  { %633 = vrot.lane.b32.xlu1 %v3433_v40, %s3235_s25 }
 0x506   :  { %v552_v44 = vpop.permute.xlu0 %551 }
 0x507   :  { %v554_v47 = vmul.f32 %v552_v44, %v549_v41 }
 0x509   :  { %v3438_v48 = vadd.f32 %v555_v45, %v554_v47 }
 0x50b   :  { %558 = vrot.lane.b32.xlu0 %v3438_v48, %s3235_s25 }
 0x51e   :  { %v634_v49 = vpop.permute.xlu1 %633 }
 0x51f   :  { %2739 = vmatmul.mubr.msk.f32.vlgmr.msra.gmra.mrb[6].mxu1 %vm179_vm2, %v634_v49 }
 0x520   :  { %2998 = vmatpush3.bf16.msra.mxu1 %v3350_v43  ;;  %2760 = vmatprep.mubr.msk.f32.mxu1 %vm3233_vm1, %v3234_v10 }
 0x521   :  { %2999 = vmatprep.subr.bf16.mxu1 %v3232_v3 }
 0x524   :  { %3001 = vmatpush3.bf16.msra.mxu1 %v3361_v46 }
 0x525   :  { %3008 = vmatprep.subr.bf16.mxu1 %v3232_v3 }
 0x57d   :  { %v559_v50 = vpop.permute.xlu0 %558 }
 0x57e   :  { %2728 = vmatmul.mubr.msk.f32.vlgmr.msra.gmra.mrb[10].mxu0 %vm179_vm2, %v559_v50 }
 0x57f   :  { %2992 = vmatpush3.bf16.msra.mxu0 %v3269_v7  ;;  %2749 = vmatprep.mubr.msk.f32.mxu0 %vm3233_vm1, %v3234_v10 }
 0x580   :  { %2993 = vmatprep.subr.bf16.mxu0 %v3232_v3 }
 0x583   :  { %2995 = vmatpush3.bf16.msra.mxu0 %v3291_v13 }
 0x584   :  { %3002 = vmatprep.subr.bf16.mxu0 %v3232_v3 }
 0x586   :  { %2750 = vmatmul.mubr.msk.f32.vlgmr.msra.gmra.mrb[12].mxu0 %vm179_vm2, %v559_v50 }
 0x587   :  { %3004 = vmatpush3.bf16.msra.mxu0 %v3329_v36  ;;  %2771 = vmatprep.mubr.msk.f32.mxu0 %vm3233_vm1, %v3234_v10 }
 0x588   :  { %3005 = vmatprep.subr.bf16.mxu0 %v3232_v3 }
 0x58b   :  { %3007 = vmatpush3.bf16.msra.mxu0 %v3348_v42 }
 0x58c   :  { %3014 = vmatprep.subr.bf16.mxu0 %v3232_v3 }
 0x5f2   :  { %v703_v52 = vpop.f32.mrb[6].mxu1 }
 0x5f3   :  { %v714_v53 = vadd.f32 %v703_v52, %v3406_v63  ;;  %v2740_v54 = vpop.f32.mrb[7].mxu1 }
 0x5f5   :  { %716 = vrot.lane.b32.xlu1 %v714_v53, %s3236_s28 }
 0x651   :  { %v628_v61 = vpop.f32.mrb[10].mxu0 }
 0x652   :  { %v629_v62 = vadd.f32 %v3386_v51, %v628_v61  ;;  %v2729_v0 = vpop.f32.mrb[11].mxu0 }
 0x654   :  { %v707_v1 = vadd.f32 %v703_v52, %v629_v62 }
 0x656   :  { %v2491_v2 = vmul.f32 -1.442695, %v707_v1 }
 0x658   :  { %3128 = vpow2.f32 %v2491_v2 }
 0x659   :  { %v800_v4 = vpop.f32.mrb[12].mxu0 }
 0x65a   :  { %v811_v5 = vadd.f32 %v800_v4, %v3303_v16  ;;  %v2751_v6 = vpop.f32.mrb[13].mxu0  ;;  %v804_v19 = vadd.f32 %v800_v4, %v151_v18 }
 0x65c   :  { %813 = vrot.lane.b32.xlu0 %v811_v5, %s3236_s28  ;;  %v2493_v20 = vmul.f32 -1.442695, %v804_v19 }
 0x662   :  { %v3129_v8 = vpop.eup %3128 }
 0x663   :  { %v711_v9 = vadd.f32 1.0, %v3129_v8  ;;  %v156_v8 = vadd.f32 %v3394_v55, %v3283_v11 }
 0x665   :  { %3130 = vrcp.f32 %v711_v9 }
 0x666   :  { %3132 = vpow2.f32 %v2493_v20 }
 0x667   :  { %v717_v15 = vpop.permute.xlu1 %716 }
 0x66f   :  { %v3131_v12 = vpop.eup %3130 }
 0x670   :  { %v719_v17 = vmul.f32 %v3131_v12, %v717_v15  ;;  %v3133_v21 = vpop.eup %3132  ;;  %v726_v31 = vsub.f32 1.0, %v3131_v12  ;;  %v732_v33 = vmul.f32 %v3131_v12, %v3433_v40 }
 0x671   :  { %v808_v22 = vadd.f32 1.0, %v3133_v21 }
 0x672   :  { %721 = vrot.lane.b32.xlu1 %v719_v17, %s3236_s28 }
 0x673   :  { %3134 = vrcp.f32 %v808_v22 }
 0x67d   :  { %v3135_v23 = vpop.eup %3134 }
 0x67e   :  { %v823_v35 = vsub.f32 1.0, %v3135_v23  ;;  %v829_v38 = vmul.f32 %v3135_v23, %v3438_v48 }
 0x6ce   :  { %v814_v24 = vpop.permute.xlu0 %813 }
 0x6cf   :  { %v816_v25 = vmul.f32 %v3135_v23, %v814_v24 }
 0x6d1   :  { %818 = vrot.lane.b32.xlu0 %v816_v25, %s3236_s28 }
 0x6e4   :  { %v722_v26 = vpop.permute.xlu1 %721 }
 0x6e5   :  { %v724_v27 = vadd.f32 %v722_v26, %v629_v62 }
 0x6e7   :  { %3136 = vtanh.f32 %v724_v27 }
 0x6f1   :  { %v3137_v28 = vpop.eup %3136 }
 0x6f2   :  { %728 = vrot.lane.b32.xlu1 %v3137_v28, %s3235_s25 }
 0x743   :  { %v819_v29 = vpop.permute.xlu0 %818 }
 0x744   :  { %v821_v30 = vadd.f32 %v819_v29, %v151_v18 }
 0x746   :  { %3138 = vtanh.f32 %v821_v30 }
 0x750   :  { %v3139_v56 = vpop.eup %3138 }
 0x751   :  { %825 = vrot.lane.b32.xlu0 %v3139_v56, %s3235_s25 }
 0x764   :  { %v729_v32 = vpop.permute.xlu1 %728 }
 0x765   :  { %v731_v34 = vmul.f32 %v729_v32, %v726_v31 }
 0x767   :  { %v3475_v14 = vadd.f32 %v732_v33, %v731_v34 }
 0x769   :  { %907 = vrot.lane.b32.xlu1 %v3475_v14, %s3235_s25 }
 0x7c3   :  { %v826_v37 = vpop.permute.xlu0 %825 }
 0x7c4   :  { %v828_v39 = vmul.f32 %v826_v37, %v823_v35 }
 0x7c6   :  { %v3480_v41 = vadd.f32 %v829_v38, %v828_v39 }
 0x7c8   :  { %832 = vrot.lane.b32.xlu0 %v3480_v41, %s3235_s25 }
 0x7db   :  { %v908_v44 = vpop.permute.xlu1 %907 }
 0x7dc   :  { %2772 = vmatmul.mubr.msk.f32.vlgmr.msra.gmra.mrb[14].mxu0 %vm179_vm2, %v908_v44 }
 0x7dd   :  { %3016 = vmatpush3.bf16.msra.mxu0 %v3350_v43  ;;  %2793 = vmatprep.mubr.msk.f32.mxu0 %vm3233_vm1, %v3234_v10 }
 0x7de   :  { %3017 = vmatprep.subr.bf16.mxu0 %v3232_v3 }
 0x7e1   :  { %3019 = vmatpush3.bf16.msra.mxu0 %v3361_v46 }
 0x7e2   :  { %3026 = vmatprep.subr.bf16.mxu0 %v3232_v3 }
 0x83a   :  { %v833_v40 = vpop.permute.xlu0 %832 }
 0x83b   :  { %2761 = vmatmul.mubr.msk.f32.vlgmr.msra.gmra.mrb[8].mxu1 %vm179_vm2, %v833_v40 }
 0x83c   :  { %3010 = vmatpush3.bf16.msra.mxu1 %v3269_v7  ;;  %2782 = vmatprep.mubr.msk.f32.mxu1 %vm3233_vm1, %v3234_v10 }
 0x83d   :  { %3011 = vmatprep.subr.bf16.mxu1 %v3232_v3 }
 0x840   :  { %3013 = vmatpush3.bf16.msra.mxu1 %v3291_v13 }
 0x841   :  { %3020 = vmatprep.subr.bf16.mxu1 %v3232_v3 }
 0x843   :  { %2783 = vmatmul.mubr.msk.f32.vlgmr.msra.gmra.mrb[10].mxu1 %vm179_vm2, %v833_v40 }
 0x844   :  { %3022 = vmatpush3.bf16.msra.mxu1 %v3329_v36  ;;  %2804 = vmatprep.mubr.msk.f32.mxu1 %vm3233_vm1, %v3234_v10 }
 0x845   :  { %3023 = vmatprep.subr.bf16.mxu1 %v3232_v3 }
 0x848   :  { %3025 = vmatpush3.bf16.msra.mxu1 %v3348_v42 }
 0x849   :  { %3032 = vmatprep.subr.bf16.mxu1 %v3232_v3 }
 0x8af   :  { %v977_v45 = vpop.f32.mrb[14].mxu0 }
 0x8b0   :  { %v988_v47 = vadd.f32 %v977_v45, %v3406_v63  ;;  %v2773_v48 = vpop.f32.mrb[15].mxu0 }
 0x8b2   :  { %990 = vrot.lane.b32.xlu0 %v988_v47, %s3236_s28 }
 0x90e   :  { %v902_v49 = vpop.f32.mrb[8].mxu1 }
 0x90f   :  { %v903_v50 = vadd.f32 %v3386_v51, %v902_v49  ;;  %v2762_v52 = vpop.f32.mrb[9].mxu1 }
 0x911   :  { %v981_v53 = vadd.f32 %v977_v45, %v903_v50 }
 0x913   :  { %v2496_v54 = vmul.f32 -1.442695, %v981_v53 }
 0x915   :  { %3140 = vpow2.f32 %v2496_v54 }
 0x916   :  { %v1074_v61 = vpop.f32.mrb[10].mxu1 }
 0x917   :  { %v1085_v62 = vadd.f32 %v1074_v61, %v3303_v16  ;;  %v2784_v0 = vpop.f32.mrb[11].mxu1  ;;  %v1078_v9 = vadd.f32 %v1074_v61, %v156_v8 }
 0x918   :  { %v161_v0 = vadd.f32 %v3283_v11, %v3400_v58 }
 0x919   :  { %1087 = vrot.lane.b32.xlu1 %v1085_v62, %s3236_s28  ;;  %v2498_v12 = vmul.f32 -1.442695, %v1078_v9 }
 0x91f   :  { %v3141_v1 = vpop.eup %3140 }
 0x920   :  { %v985_v2 = vadd.f32 1.0, %v3141_v1 }
 0x922   :  { %3142 = vrcp.f32 %v985_v2 }
 0x923   :  { %3144 = vpow2.f32 %v2498_v12 }
 0x924   :  { %v991_v5 = vpop.permute.xlu0 %990 }
 0x92c   :  { %v3143_v4 = vpop.eup %3142 }
 0x92d   :  { %v993_v6 = vmul.f32 %v3143_v4, %v991_v5  ;;  %v3145_v15 = vpop.eup %3144  ;;  %v1000_v26 = vsub.f32 1.0, %v3143_v4  ;;  %v1006_v28 = vmul.f32 %v3143_v4, %v3475_v14 }
 0x92e   :  { %v1082_v17 = vadd.f32 1.0, %v3145_v15 }
 0x92f   :  { %995 = vrot.lane.b32.xlu0 %v993_v6, %s3236_s28 }
 0x930   :  { %3146 = vrcp.f32 %v1082_v17 }
 0x93a   :  { %v3147_v18 = vpop.eup %3146 }
 0x93b   :  { %v1097_v56 = vsub.f32 1.0, %v3147_v18  ;;  %v1103_v32 = vmul.f32 %v3147_v18, %v3480_v41 }
 0x98b   :  { %v1088_v19 = vpop.permute.xlu1 %1087 }
 0x98c   :  { %v1090_v20 = vmul.f32 %v3147_v18, %v1088_v19 }
 0x98e   :  { %1092 = vrot.lane.b32.xlu1 %v1090_v20, %s3236_s28 }
 0x9a1   :  { %v996_v21 = vpop.permute.xlu0 %995 }
 0x9a2   :  { %v998_v22 = vadd.f32 %v996_v21, %v903_v50 }
 0x9a4   :  { %3148 = vtanh.f32 %v998_v22 }
 0x9ae   :  { %v3149_v23 = vpop.eup %3148 }
 0x9af   :  { %1002 = vrot.lane.b32.xlu0 %v3149_v23, %s3235_s25 }
 0xa00   :  { %v1093_v24 = vpop.permute.xlu1 %1092 }
 0xa01   :  { %v1095_v25 = vadd.f32 %v1093_v24, %v156_v8 }
 0xa03   :  { %3150 = vtanh.f32 %v1095_v25 }
 0xa0d   :  { %v3151_v55 = vpop.eup %3150 }
 0xa0e   :  { %1099 = vrot.lane.b32.xlu1 %v3151_v55, %s3235_s25 }
 0xa21   :  { %v1003_v27 = vpop.permute.xlu0 %1002 }
 0xa22   :  { %v1005_v29 = vmul.f32 %v1003_v27, %v1000_v26 }
 0xa24   :  { %v3517_v30 = vadd.f32 %v1006_v28, %v1005_v29 }
 0xa26   :  { %1181 = vrot.lane.b32.xlu0 %v3517_v30, %s3235_s25 }
 0xa80   :  { %v1100_v31 = vpop.permute.xlu1 %1099 }
 0xa81   :  { %v1102_v33 = vmul.f32 %v1100_v31, %v1097_v56 }
 0xa83   :  { %v3522_v34 = vadd.f32 %v1103_v32, %v1102_v33 }
 0xa85   :  { %1106 = vrot.lane.b32.xlu1 %v3522_v34, %s3235_s25 }
 0xa98   :  { %v1182_v35 = vpop.permute.xlu0 %1181 }
 0xa99   :  { %2805 = vmatmul.mubr.msk.f32.vlgmr.msra.gmra.mrb[12].mxu1 %vm179_vm2, %v1182_v35 }
 0xa9a   :  { %3034 = vmatpush3.bf16.msra.mxu1 %v3350_v43  ;;  %2826 = vmatprep.mubr.msk.f32.mxu1 %vm3233_vm1, %v3234_v10 }
 0xa9b   :  { %3035 = vmatprep.subr.bf16.mxu1 %v3232_v3 }
 0xa9e   :  { %3037 = vmatpush3.bf16.msra.mxu1 %v3361_v46 }
 0xa9f   :  { %3044 = vmatprep.subr.bf16.mxu1 %v3232_v3 }
 0xaf7   :  { %v1107_v14 = vpop.permute.xlu1 %1106 }
 0xaf8   :  { %2794 = vmatmul.mubr.msk.f32.vlgmr.msra.gmra.mrb[16].mxu0 %vm179_vm2, %v1107_v14 }
 0xaf9   :  { %3028 = vmatpush3.bf16.msra.mxu0 %v3269_v7  ;;  %2815 = vmatprep.mubr.msk.f32.mxu0 %vm3233_vm1, %v3234_v10 }
 0xafa   :  { %3029 = vmatprep.subr.bf16.mxu0 %v3232_v3 }
 0xafd   :  { %3031 = vmatpush3.bf16.msra.mxu0 %v3291_v13 }
 0xafe   :  { %3038 = vmatprep.subr.bf16.mxu0 %v3232_v3 }
 0xb00   :  { %2816 = vmatmul.mubr.msk.f32.vlgmr.msra.gmra.mrb[18].mxu0 %vm179_vm2, %v1107_v14 }
 0xb01   :  { %3040 = vmatpush3.bf16.msra.mxu0 %v3329_v36  ;;  %2837 = vmatprep.mubr.msk.f32.mxu0 %vm3233_vm1, %v3234_v10 }
 0xb02   :  { %3041 = vmatprep.subr.bf16.mxu0 %v3232_v3 }
 0xb05   :  { %3043 = vmatpush3.bf16.msra.mxu0 %v3348_v42 }
 0xb06   :  { %3050 = vmatprep.subr.bf16.mxu0 %v3232_v3 }
 0xb6c   :  { %v1251_v37 = vpop.f32.mrb[12].mxu1 }
 0xb6d   :  { %v1262_v38 = vadd.f32 %v1251_v37, %v3406_v63  ;;  %v2806_v39 = vpop.f32.mrb[13].mxu1 }
 0xb6f   :  { %1264 = vrot.lane.b32.xlu0 %v1262_v38, %s3236_s28 }
 0xbcb   :  { %v1176_v41 = vpop.f32.mrb[16].mxu0 }
 0xbcc   :  { %v1177_v44 = vadd.f32 %v3386_v51, %v1176_v41  ;;  %v2795_v40 = vpop.f32.mrb[17].mxu0 }
 0xbce   :  { %v1255_v45 = vadd.f32 %v1251_v37, %v1177_v44 }
 0xbd0   :  { %v2501_v47 = vmul.f32 -1.442695, %v1255_v45 }
 0xbd2   :  { %3152 = vpow2.f32 %v2501_v47 }
 0xbd3   :  { %v1348_v48 = vpop.f32.mrb[18].mxu0 }
 0xbd4   :  { %v1359_v49 = vadd.f32 %v1348_v48, %v3303_v16  ;;  %v2817_v50 = vpop.f32.mrb[19].mxu0  ;;  %v1352_v1 = vadd.f32 %v1348_v48, %v161_v0 }
 0xbd6   :  { %1361 = vrot.lane.b32.xlu1 %v1359_v49, %s3236_s28  ;;  %v2503_v2 = vmul.f32 -1.442695, %v1352_v1  ;;  %v166_v49 = vadd.f32 %v3398_v57, %v3283_v11 }
 0xbdc   :  { %v3153_v52 = vpop.eup %3152 }
 0xbdd   :  { %v1259_v53 = vadd.f32 1.0, %v3153_v52 }
 0xbdf   :  { %3154 = vrcp.f32 %v1259_v53 }
 0xbe0   :  { %3156 = vpow2.f32 %v2503_v2 }
 0xbe1   :  { %v1265_v61 = vpop.permute.xlu0 %1264 }
 0xbe9   :  { %v3155_v54 = vpop.eup %3154 }
 0xbea   :  { %v1267_v62 = vmul.f32 %v3155_v54, %v1265_v61  ;;  %v3157_v4 = vpop.eup %3156  ;;  %v1274_v20 = vsub.f32 1.0, %v3155_v54  ;;  %v1280_v22 = vmul.f32 %v3155_v54, %v3517_v30 }
 0xbeb   :  { %v1356_v5 = vadd.f32 1.0, %v3157_v4 }
 0xbec   :  { %1269 = vrot.lane.b32.xlu0 %v1267_v62, %s3236_s28 }
 0xbed   :  { %3158 = vrcp.f32 %v1356_v5 }
 0xbf7   :  { %v3159_v6 = vpop.eup %3158 }
 0xbf8   :  { %v1371_v25 = vsub.f32 1.0, %v3159_v6  ;;  %v1377_v26 = vmul.f32 %v3159_v6, %v3522_v34 }
 0xc48   :  { %v1362_v8 = vpop.permute.xlu1 %1361 }
 0xc49   :  { %v1364_v9 = vmul.f32 %v3159_v6, %v1362_v8 }
 0xc4b   :  { %1366 = vrot.lane.b32.xlu1 %v1364_v9, %s3236_s28 }
 0xc5e   :  { %v1270_v12 = vpop.permute.xlu0 %1269 }
 0xc5f   :  { %v1272_v15 = vadd.f32 %v1270_v12, %v1177_v44 }
 0xc61   :  { %3160 = vtanh.f32 %v1272_v15 }
 0xc6b   :  { %v3161_v17 = vpop.eup %3160 }
 0xc6c   :  { %1276 = vrot.lane.b32.xlu0 %v3161_v17, %s3235_s25 }
 0xcbd   :  { %v1367_v18 = vpop.permute.xlu1 %1366 }
 0xcbe   :  { %v1369_v19 = vadd.f32 %v1367_v18, %v161_v0 }
 0xcc0   :  { %3162 = vtanh.f32 %v1369_v19 }
 0xcca   :  { %v3163_v58 = vpop.eup %3162 }
 0xccb   :  { %1373 = vrot.lane.b32.xlu1 %v3163_v58, %s3235_s25 }
 0xcde   :  { %v1277_v21 = vpop.permute.xlu0 %1276 }
 0xcdf   :  { %v1279_v23 = vmul.f32 %v1277_v21, %v1274_v20 }
 0xce1   :  { %v3559_v24 = vadd.f32 %v1280_v22, %v1279_v23 }
 0xce3   :  { %1455 = vrot.lane.b32.xlu0 %v3559_v24, %s3235_s25 }
 0xd3d   :  { %v1374_v55 = vpop.permute.xlu1 %1373 }
 0xd3e   :  { %v1376_v27 = vmul.f32 %v1374_v55, %v1371_v25 }
 0xd40   :  { %v3564_v28 = vadd.f32 %v1377_v26, %v1376_v27 }
 0xd42   :  { %1380 = vrot.lane.b32.xlu1 %v3564_v28, %s3235_s25 }
 0xd55   :  { %v1456_v29 = vpop.permute.xlu0 %1455 }
 0xd56   :  { %2838 = vmatmul.mubr.msk.f32.vlgmr.msra.gmra.mrb[20].mxu0 %vm179_vm2, %v1456_v29 }
 0xd57   :  { %3052 = vmatpush3.bf16.msra.mxu0 %v3350_v43  ;;  %2859 = vmatprep.mubr.msk.f32.mxu0 %vm3233_vm1, %v3234_v10 }
 0xd58   :  { %3053 = vmatprep.subr.bf16.mxu0 %v3232_v3 }
 0xd5b   :  { %3055 = vmatpush3.bf16.msra.mxu0 %v3361_v46 }
 0xd5c   :  { %3062 = vmatprep.subr.bf16.mxu0 %v3232_v3 }
 0xdb4   :  { %v1381_v30 = vpop.permute.xlu1 %1380 }
 0xdb5   :  { %2827 = vmatmul.mubr.msk.f32.vlgmr.msra.gmra.mrb[14].mxu1 %vm179_vm2, %v1381_v30 }
 0xdb6   :  { %3046 = vmatpush3.bf16.msra.mxu1 %v3269_v7  ;;  %2848 = vmatprep.mubr.msk.f32.mxu1 %vm3233_vm1, %v3234_v10 }
 0xdb7   :  { %3047 = vmatprep.subr.bf16.mxu1 %v3232_v3 }
 0xdba   :  { %3049 = vmatpush3.bf16.msra.mxu1 %v3291_v13 }
 0xdbb   :  { %3056 = vmatprep.subr.bf16.mxu1 %v3232_v3 }
 0xdbd   :  { %2849 = vmatmul.mubr.msk.f32.vlgmr.msra.gmra.mrb[16].mxu1 %vm179_vm2, %v1381_v30 }
 0xdbe   :  { %3058 = vmatpush3.bf16.msra.mxu1 %v3329_v36  ;;  %2870 = vmatprep.mubr.msk.f32.mxu1 %vm3233_vm1, %v3234_v10 }
 0xdbf   :  { %3059 = vmatprep.subr.bf16.mxu1 %v3232_v3 }
 0xdc2   :  { %3061 = vmatpush3.bf16.msra.mxu1 %v3348_v42 }
 0xdc3   :  { %3068 = vmatprep.subr.bf16.mxu1 %v3232_v3 }
 0xe29   :  { %v1525_v56 = vpop.f32.mrb[20].mxu0 }
 0xe2a   :  { %v1536_v31 = vadd.f32 %v1525_v56, %v3406_v63  ;;  %v2839_v32 = vpop.f32.mrb[21].mxu0 }
 0xe2c   :  { %1538 = vrot.lane.b32.xlu0 %v1536_v31, %s3236_s28 }
 0xe88   :  { %v1450_v33 = vpop.f32.mrb[14].mxu1 }
 0xe89   :  { %v1451_v34 = vadd.f32 %v3386_v51, %v1450_v33  ;;  %v2828_v35 = vpop.f32.mrb[15].mxu1 }
 0xe8b   :  { %v1529_v14 = vadd.f32 %v1525_v56, %v1451_v34 }
 0xe8d   :  { %v2506_v37 = vmul.f32 -1.442695, %v1529_v14 }
 0xe8f   :  { %3164 = vpow2.f32 %v2506_v37 }
 0xe90   :  { %v1622_v38 = vpop.f32.mrb[16].mxu1 }
 0xe91   :  { %v1633_v39 = vadd.f32 %v1622_v38, %v3303_v16  ;;  %v2850_v41 = vpop.f32.mrb[17].mxu1  ;;  %v1626_v50 = vadd.f32 %v1622_v38, %v166_v49  ;;  %v171_v38 = vadd.f32 %v3283_v11, %v3404_v60 }
 0xe93   :  { %1635 = vrot.lane.b32.xlu1 %v1633_v39, %s3236_s28  ;;  %v2508_v52 = vmul.f32 -1.442695, %v1626_v50 }
 0xe99   :  { %v3165_v44 = vpop.eup %3164 }
 0xe9a   :  { %v1533_v40 = vadd.f32 1.0, %v3165_v44 }
 0xe9c   :  { %3166 = vrcp.f32 %v1533_v40 }
 0xe9d   :  { %3168 = vpow2.f32 %v2508_v52 }
 0xe9e   :  { %v1539_v47 = vpop.permute.xlu0 %1538 }
 0xea6   :  { %v3167_v45 = vpop.eup %3166 }
 0xea7   :  { %v1541_v48 = vmul.f32 %v3167_v45, %v1539_v47  ;;  %v3169_v53 = vpop.eup %3168  ;;  %v1548_v8 = vsub.f32 1.0, %v3167_v45  ;;  %v1554_v12 = vmul.f32 %v3167_v45, %v3559_v24 }
 0xea8   :  { %v1630_v54 = vadd.f32 1.0, %v3169_v53 }
 0xea9   :  { %1543 = vrot.lane.b32.xlu0 %v1541_v48, %s3236_s28 }
 0xeaa   :  { %3170 = vrcp.f32 %v1630_v54 }
 0xeb4   :  { %v3171_v61 = vpop.eup %3170 }
 0xeb5   :  { %v1645_v18 = vsub.f32 1.0, %v3171_v61  ;;  %v1651_v58 = vmul.f32 %v3171_v61, %v3564_v28 }
 0xf05   :  { %v1636_v62 = vpop.permute.xlu1 %1635 }
 0xf06   :  { %v1638_v0 = vmul.f32 %v3171_v61, %v1636_v62 }
 0xf08   :  { %1640 = vrot.lane.b32.xlu1 %v1638_v0, %s3236_s28 }
 0xf1b   :  { %v1544_v1 = vpop.permute.xlu0 %1543 }
 0xf1c   :  { %v1546_v2 = vadd.f32 %v1544_v1, %v1451_v34 }
 0xf1e   :  { %3172 = vtanh.f32 %v1546_v2 }
 0xf28   :  { %v3173_v4 = vpop.eup %3172 }
 0xf29   :  { %1550 = vrot.lane.b32.xlu0 %v3173_v4, %s3235_s25 }
 0xf7a   :  { %v1641_v5 = vpop.permute.xlu1 %1640 }
 0xf7b   :  { %v1643_v6 = vadd.f32 %v1641_v5, %v166_v49 }
 0xf7d   :  { %3174 = vtanh.f32 %v1643_v6 }
 0xf87   :  { %v3175_v57 = vpop.eup %3174 }
 0xf88   :  { %1647 = vrot.lane.b32.xlu1 %v3175_v57, %s3235_s25 }
 0xf9b   :  { %v1551_v9 = vpop.permute.xlu0 %1550 }
 0xf9c   :  { %v1553_v15 = vmul.f32 %v1551_v9, %v1548_v8 }
 0xf9e   :  { %v3601_v17 = vadd.f32 %v1554_v12, %v1553_v15 }
 0xfa0   :  { %1729 = vrot.lane.b32.xlu0 %v3601_v17, %s3235_s25 }
 0xffa   :  { %v1648_v19 = vpop.permute.xlu1 %1647 }
 0xffb   :  { %v1650_v20 = vmul.f32 %v1648_v19, %v1645_v18 }
 0xffd   :  { %v3606_v21 = vadd.f32 %v1651_v58, %v1650_v20 }
 0xfff   :  { %1654 = vrot.lane.b32.xlu1 %v3606_v21, %s3235_s25 }
0x1012   :  { %v1730_v22 = vpop.permute.xlu0 %1729 }
0x1013   :  { %2871 = vmatmul.mubr.msk.f32.vlgmr.msra.gmra.mrb[18].mxu1 %vm179_vm2, %v1730_v22 }
0x1014   :  { %3070 = vmatpush3.bf16.msra.mxu1 %v3350_v43  ;;  %2892 = vmatprep.mubr.msk.f32.mxu1 %vm3233_vm1, %v3234_v10 }
0x1015   :  { %3071 = vmatprep.subr.bf16.mxu1 %v3232_v3 }
0x1018   :  { %3073 = vmatpush3.bf16.msra.mxu1 %v3361_v46 }
0x1019   :  { %3080 = vmatprep.subr.bf16.mxu1 %v3232_v3 }
0x1071   :  { %v1655_v23 = vpop.permute.xlu1 %1654 }
0x1072   :  { %2860 = vmatmul.mubr.msk.f32.vlgmr.msra.gmra.mrb[22].mxu0 %vm179_vm2, %v1655_v23 }
0x1073   :  { %3064 = vmatpush3.bf16.msra.mxu0 %v3269_v7  ;;  %2881 = vmatprep.mubr.msk.f32.mxu0 %vm3233_vm1, %v3234_v10 }
0x1074   :  { %3065 = vmatprep.subr.bf16.mxu0 %v3232_v3 }
0x1077   :  { %3067 = vmatpush3.bf16.msra.mxu0 %v3291_v13 }
0x1078   :  { %3074 = vmatprep.subr.bf16.mxu0 %v3232_v3 }
0x107a   :  { %2882 = vmatmul.mubr.msk.f32.vlgmr.msra.gmra.mrb[24].mxu0 %vm179_vm2, %v1655_v23 }
0x107b   :  { %3076 = vmatpush3.bf16.msra.mxu0 %v3329_v36  ;;  %2903 = vmatprep.mubr.msk.f32.mxu0 %vm3233_vm1, %v3234_v10 }
0x107c   :  { %3077 = vmatprep.subr.bf16.mxu0 %v3232_v3 }
0x107f   :  { %3079 = vmatpush3.bf16.msra.mxu0 %v3348_v42 }
0x1080   :  { %3086 = vmatprep.subr.bf16.mxu0 %v3232_v3 }
0x10e6   :  { %v1799_v24 = vpop.f32.mrb[18].mxu1 }
0x10e7   :  { %v1810_v25 = vadd.f32 %v1799_v24, %v3406_v63  ;;  %v2872_v55 = vpop.f32.mrb[19].mxu1 }
0x10e9   :  { %1812 = vrot.lane.b32.xlu0 %v1810_v25, %s3236_s28 }
0x1145   :  { %v1724_v26 = vpop.f32.mrb[22].mxu0 }
0x1146   :  { %v1725_v27 = vadd.f32 %v3386_v51, %v1724_v26  ;;  %v2861_v28 = vpop.f32.mrb[23].mxu0 }
0x1148   :  { %v1803_v29 = vadd.f32 %v1799_v24, %v1725_v27 }
0x114a   :  { %v2511_v30 = vmul.f32 -1.442695, %v1803_v29 }
0x114c   :  { %3176 = vpow2.f32 %v2511_v30 }
0x114d   :  { %v1896_v56 = vpop.f32.mrb[24].mxu0 }
0x114e   :  { %v1907_v31 = vadd.f32 %v1896_v56, %v3303_v16  ;;  %v2883_v32 = vpop.f32.mrb[25].mxu0  ;;  %v1900_v39 = vadd.f32 %v1896_v56, %v171_v38 }
0x1150   :  { %1909 = vrot.lane.b32.xlu1 %v1907_v31, %s3236_s28  ;;  %v2513_v41 = vmul.f32 -1.442695, %v1900_v39 }
0x1156   :  { %v3177_v33 = vpop.eup %3176 }
0x1157   :  { %v1807_v34 = vadd.f32 1.0, %v3177_v33 }
0x1159   :  { %3178 = vrcp.f32 %v1807_v34 }
0x115a   :  { %3180 = vpow2.f32 %v2513_v41 }
0x115b   :  { %v1813_v14 = vpop.permute.xlu0 %1812 }
0x1163   :  { %v3179_v35 = vpop.eup %3178 }
0x1164   :  { %v1815_v37 = vmul.f32 %v3179_v35, %v1813_v14  ;;  %v3181_v44 = vpop.eup %3180  ;;  %v1822_v60 = vsub.f32 1.0, %v3179_v35  ;;  %v1828_v62 = vmul.f32 %v3179_v35, %v3601_v17 }
0x1165   :  { %v1904_v40 = vadd.f32 1.0, %v3181_v44 }
0x1166   :  { %1817 = vrot.lane.b32.xlu0 %v1815_v37, %s3236_s28 }
0x1167   :  { %3182 = vrcp.f32 %v1904_v40 }
0x1171   :  { %v3183_v45 = vpop.eup %3182 }
0x1172   :  { %v1919_v2 = vsub.f32 1.0, %v3183_v45  ;;  %v1925_v5 = vmul.f32 %v3183_v45, %v3606_v21 }
0x11c2   :  { %v1910_v47 = vpop.permute.xlu1 %1909 }
0x11c3   :  { %v1912_v48 = vmul.f32 %v3183_v45, %v1910_v47 }
0x11c5   :  { %1914 = vrot.lane.b32.xlu1 %v1912_v48, %s3236_s28 }
0x11d8   :  { %v1818_v49 = vpop.permute.xlu0 %1817 }
0x11d9   :  { %v1820_v50 = vadd.f32 %v1818_v49, %v1725_v27 }
0x11db   :  { %3184 = vtanh.f32 %v1820_v50 }
0x11e5   :  { %v3185_v52 = vpop.eup %3184 }
0x11e6   :  { %1824 = vrot.lane.b32.xlu0 %v3185_v52, %s3235_s25 }
0x1237   :  { %v1915_v53 = vpop.permute.xlu1 %1914 }
0x1238   :  { %v1917_v54 = vadd.f32 %v1915_v53, %v171_v38 }
0x123a   :  { %3186 = vtanh.f32 %v1917_v54  ;;  %v3207_v54 = vld [vmem:[%s3731_s1 + $0x78] ss:$0 sm:$0xff] }
0x1244   :  { %v3187_v11 = vpop.eup %3186 }
0x1245   :  { %1921 = vrot.lane.b32.xlu1 %v3187_v11, %s3235_s25 }
0x1258   :  { %v1825_v61 = vpop.permute.xlu0 %1824 }
0x1259   :  { %v1827_v0 = vmul.f32 %v1825_v61, %v1822_v60 }
0x125b   :  { %v3643_v1 = vadd.f32 %v1828_v62, %v1827_v0 }
0x125d   :  { %2003 = vrot.lane.b32.xlu0 %v3643_v1, %s3235_s25 }
0x12b7   :  { %v1922_v4 = vpop.permute.xlu1 %1921 }
0x12b8   :  { %v1924_v6 = vmul.f32 %v1922_v4, %v1919_v2 }
0x12ba   :  { %v3648_v57 = vadd.f32 %v1925_v5, %v1924_v6  ;;  %v36_v6 = vld [vmem:[%s3731_s1 + $0x80] sm:$0xff] }
0x12bc   :  { %1928 = vrot.lane.b32.xlu1 %v3648_v57, %s3235_s25 }
0x12cf   :  { %v2004_v8 = vpop.permute.xlu0 %2003 }
0x12d0   :  { %2904 = vmatmul.mubr.msk.f32.vlgmr.msra.gmra.mrb[26].mxu0 %vm179_vm2, %v2004_v8  ;;  %v38_v8 = vld [vmem:[%s3731_s1 + $0x90] sm:$0xff] }
0x12d1   :  { %3088 = vmatpush3.bf16.msra.mxu0 %v3350_v43  ;;  %2925 = vmatprep.mubr.msk.f32.mxu0 %vm3233_vm1, %v3234_v10 }
0x12d2   :  { %3089 = vmatprep.subr.bf16.mxu0 %v3232_v3 }
0x12d5   :  { %3091 = vmatpush3.bf16.msra.mxu0 %v3361_v46 }
0x12d6   :  { %3098 = vmatprep.subr.bf16.mxu0 %v3232_v3 }
0x132e   :  { %v1929_v9 = vpop.permute.xlu1 %1928 }
0x132f   :  { %2893 = vmatmul.mubr.msk.f32.vlgmr.msra.gmra.mrb[20].mxu1 %vm179_vm2, %v1929_v9 }
0x1330   :  { %3082 = vmatpush3.bf16.msra.mxu1 %v3269_v7  ;;  %2914 = vmatprep.mubr.msk.f32.mxu1 %vm3233_vm1, %v3234_v10 }
0x1331   :  { %3083 = vmatprep.subr.bf16.mxu1 %v3232_v3 }
0x1334   :  { %3085 = vmatpush3.bf16.msra.mxu1 %v3291_v13 }
0x1335   :  { %3092 = vmatprep.subr.bf16.mxu1 %v3232_v3 }
0x1337   :  { %2915 = vmatmul.mubr.msk.f32.vlgmr.msra.gmra.mrb[22].mxu1 %vm179_vm2, %v1929_v9 }
0x1338   :  { %3094 = vmatpush3.bf16.msra.mxu1 %v3329_v36  ;;  %2936 = vmatprep.mubr.msk.f32.mxu1 %vm3233_vm1, %v3234_v10 }
0x1339   :  { %3095 = vmatprep.subr.bf16.mxu1 %v3232_v3 }
0x133c   :  { %3097 = vmatpush3.bf16.msra.mxu1 %v3348_v42 }
0x13a3   :  { %v2073_v7 = vpop.f32.mrb[26].mxu0 }
0x13a4   :  { %v2084_v43 = vadd.f32 %v2073_v7, %v3406_v63  ;;  %v2905_v46 = vpop.f32.mrb[27].mxu0 }
0x13a6   :  { %2086 = vrot.lane.b32.xlu0 %v2084_v43, %s3236_s28 }
0x1402   :  { %v1998_v13 = vpop.f32.mrb[20].mxu1 }
0x1403   :  { %v1999_v12 = vadd.f32 %v3386_v51, %v1998_v13  ;;  %v2894_v15 = vpop.f32.mrb[21].mxu1  ;;  %v3206_v51 = vld [vmem:[%s3731_s1 + $0x30] ss:$0 sm:$0xff] }
0x1404   :  { %v176_v24 = vadd.f32 %v3206_v51, %v3402_v59 }
0x1405   :  { %v2077_v17 = vadd.f32 %v2073_v7, %v1999_v12  ;;  %v39_v7 = vld [vmem:[%s3731_s1 + $0x98] sm:$0xff] }
0x1406   :  { %v3102_v43 = vpack.c.bf16 %v39_v7, %v38_v8 }
0x1407   :  { %v2516_v18 = vmul.f32 -1.442695, %v2077_v17 }
0x1409   :  { %3188 = vpow2.f32 %v2516_v18 }
0x140a   :  { %v2170_v36 = vpop.f32.mrb[22].mxu1 }
0x140b   :  { %v2181_v19 = vadd.f32 %v2170_v36, %v3303_v16  ;;  %v2916_v58 = vpop.f32.mrb[23].mxu1  ;;  %v2174_v25 = vadd.f32 %v2170_v36, %v176_v24 }
0x140c   :  { %v2522_v58 = vld [vmem:[%s3731_s1 + $0xa0] ss:$0 sm:$0xff] }
0x140d   :  { %2183 = vrot.lane.b32.xlu1 %v2181_v19, %s3236_s28  ;;  %v2518_v55 = vmul.f32 -1.442695, %v2174_v25 }
0x1413   :  { %v3189_v42 = vpop.eup %3188 }
0x1414   :  { %v2081_v20 = vadd.f32 1.0, %v3189_v42 }
0x1416   :  { %3190 = vrcp.f32 %v2081_v20 }
0x1417   :  { %3192 = vpow2.f32 %v2518_v55 }
0x1418   :  { %v2087_v22 = vpop.permute.xlu0 %2086 }
0x1420   :  { %v3191_v21 = vpop.eup %3190 }
0x1421   :  { %v2089_v23 = vmul.f32 %v3191_v21, %v2087_v22  ;;  %v3193_v16 = vpop.eup %3192  ;;  %v2096_v34 = vsub.f32 1.0, %v3191_v21  ;;  %v2102_v14 = vmul.f32 %v3191_v21, %v3643_v1 }
0x1422   :  { %v2178_v26 = vadd.f32 1.0, %v3193_v16 }
0x1423   :  { %2091 = vrot.lane.b32.xlu0 %v2089_v23, %s3236_s28 }
0x1424   :  { %3194 = vrcp.f32 %v2178_v26 }
0x142e   :  { %v3195_v27 = vpop.eup %3194 }
0x142f   :  { %v2193_v39 = vsub.f32 1.0, %v3195_v27  ;;  %v2199_v44 = vmul.f32 %v3195_v27, %v3648_v57  ;;  %v37_v57 = vld [vmem:[%s3731_s1 + $0x88] sm:$0xff] }
0x1430   :  { %v3099_v9 = vpack.c.bf16 %v37_v57, %v36_v6 }
0x147f   :  { %v2184_v28 = vpop.permute.xlu1 %2183 }
0x1480   :  { %v2186_v29 = vmul.f32 %v3195_v27, %v2184_v28 }
0x1482   :  { %2188 = vrot.lane.b32.xlu1 %v2186_v29, %s3236_s28 }
0x1495   :  { %v2092_v30 = vpop.permute.xlu0 %2091 }
0x1496   :  { %v2094_v56 = vadd.f32 %v2092_v30, %v1999_v12 }
0x1498   :  { %3196 = vtanh.f32 %v2094_v56 }
0x14a2   :  { %v3197_v31 = vpop.eup %3196 }
0x14a3   :  { %2098 = vrot.lane.b32.xlu0 %v3197_v31, %s3235_s25 }
0x14f4   :  { %v2189_v32 = vpop.permute.xlu1 %2188 }
0x14f5   :  { %v2191_v33 = vadd.f32 %v2189_v32, %v176_v24 }
0x14f7   :  { %3198 = vtanh.f32 %v2191_v33 }
0x1501   :  { %v3199_v59 = vpop.eup %3198 }
0x1502   :  { %2195 = vrot.lane.b32.xlu1 %v3199_v59, %s3235_s25 }
0x1515   :  { %v2099_v35 = vpop.permute.xlu0 %2098 }
0x1516   :  { %v2101_v37 = vmul.f32 %v2099_v35, %v2096_v34 }
0x1518   :  { %v2103_v38 = vadd.f32 %v2102_v14, %v2101_v37 }
0x151a   :  { %2277 = vrot.lane.b32.xlu0 %v2103_v38, %s3235_s25 }
0x1574   :  { %v2196_v41 = vpop.permute.xlu1 %2195 }
0x1575   :  { %v2198_v40 = vmul.f32 %v2196_v41, %v2193_v39 }
0x1577   :  { %v2200_v45 = vadd.f32 %v2199_v44, %v2198_v40 }
0x1579   :  { %2202 = vrot.lane.b32.xlu1 %v2200_v45, %s3235_s25 }
0x158c   :  { %v2278_v47 = vpop.permute.xlu0 %2277 }
0x158d   :  { %2937 = vmatmul.mubr.msk.f32.vlgmr.msra.gmra.mrb[24].mxu1 %vm179_vm2, %v2278_v47 }
0x15eb   :  { %v2203_v48 = vpop.permute.xlu1 %2202 }
0x15ec   :  { %2926 = vmatmul.mubr.msk.f32.vlgmr.msra.gmra.mrb[28].mxu0 %vm179_vm2, %v2203_v48 }
0x15ed   :  { %2947 = vmatprep.mubr.msk.f32.mxu0 %vm3233_vm1, %v3234_v10  ;;  %3100 = vmatpush3.bf16.msra.mxu0 %v3099_v9 }
0x15ee   :  { %3101 = vmatprep.subr.bf16.mxu0 %v3232_v3 }
0x15f1   :  { %3103 = vmatpush3.bf16.msra.mxu0 %v3102_v43 }
0x1660   :  { %v2347_v49 = vpop.f32.mrb[24].mxu1 }
0x1661   :  { %v2358_v50 = vadd.f32 %v2347_v49, %v3406_v63  ;;  %v2938_v52 = vpop.f32.mrb[25].mxu1 }
0x1663   :  { %2360 = vrot.lane.b32.xlu0 %v2358_v50, %s3236_s28 }
0x16bf   :  { %v2272_v53 = vpop.f32.mrb[28].mxu0 }
0x16c0   :  { %v2273_v11 = vadd.f32 %v3207_v54, %v2272_v53  ;;  %v2927_v60 = vpop.f32.mrb[29].mxu0 }
0x16c2   :  { %v2351_v61 = vadd.f32 %v2347_v49, %v2273_v11 }
0x16c4   :  { %v2521_v62 = vmul.f32 -1.442695, %v2351_v61 }
0x16c6   :  { %3200 = vpow2.f32 %v2521_v62 }
0x16d0   :  { %v3201_v0 = vpop.eup %3200 }
0x16d1   :  { %v2355_v1 = vadd.f32 1.0, %v3201_v0 }
0x16d3   :  { %3202 = vrcp.f32 %v2355_v1 }
0x16d5   :  { %v2361_v2 = vpop.permute.xlu0 %2360 }
0x16dd   :  { %v3203_v10 = vpop.eup %3202 }
0x16de   :  { %v2363_v4 = vmul.f32 %v3203_v10, %v2361_v2  ;;  %v2370_v13 = vsub.f32 1.0, %v3203_v10  ;;  %v2376_v15 = vmul.f32 %v3203_v10, %v2103_v38 }
0x16e0   :  { %2365 = vrot.lane.b32.xlu1 %v2363_v4, %s3236_s28 }
0x1752   :  { %v2366_v63 = vpop.permute.xlu1 %2365 }
0x1753   :  { %v2368_v5 = vadd.f32 %v2366_v63, %v2273_v11 }
0x1755   :  { %3204 = vtanh.f32 %v2368_v5 }
0x175f   :  { %v3205_v46 = vpop.eup %3204 }
0x1760   :  { %2372 = vrot.lane.b32.xlu0 %v3205_v46, %s3235_s25 }
0x17d2   :  { %v2373_v12 = vpop.permute.xlu0 %2372 }
0x17d3   :  { %v2375_v17 = vmul.f32 %v2373_v12, %v2370_v13 }
0x17d5   :  { %v2377_v18 = vadd.f32 %v2376_v15, %v2375_v17 }
0x17d7   :  { %v2378_v36 = vmax.f32 %v2377_v18, 0.0 }
0x17d9   :  { %2384 = vrot.lane.b32.xlu1 %v2378_v36, %s3235_s25 }
0x184b   :  { %v2385_v19 = vpop.permute.xlu1 %2384 }
0x184c   :  { %2948 = vmatmul.mubr.msk.f32.vlgmr.msra.gmra.mrb[30].mxu0 %vm179_vm2, %v2385_v19 }
0x191f   :  { %v2454_v3 = vpop.f32.mrb[30].mxu0 }
0x1920   :  { %v2455_v42 = vadd.f32 %v2522_v58, %v2454_v3  ;;  %v2949_v20 = vpop.f32.mrb[31].mxu0 }
0x1922   :  { %2459 = vst.msk [vmem:[#allocation2] sm:$0xff] %vm2458_vm3, %v2455_v42 }
0x1923   :  { %3219 = shalt.err (!%p3216_p4)
}
0x1924   :  { %s3220_s21 = scalar_lea.hbm %s3732_s2, 128 }
0x1925   :  { %p3221_p5 = scmp.ne.s32.totalorder %s3732_s2, %s3220_s21  ;;  %p3224_p6 = scmp.lt.u32.totalorder %s3220_s21, %s3732_s2 }
0x1927   :  { %p3226_p7 = pnand %p3224_p6, %p3221_p5 }
0x1929   :  { %3229 = shalt.err (!%p3226_p7)
}
0x192a   :  { %2469 = dma.vmem_to_hbm [thread:$0]  %s2467_s18, 128, %s3732_s2, [#allocation3]  }
0x192b   :  { %3230 = dma.done.wait [#allocation3], 128  }
0x192c   :  { %3231 = vsyncadd [#allocation3], 4294967168 }
0x192d   :  { %2473 = vsyncpa [#allocation3], 1 }

</bundles_post_ra>
